<compile_context>
chip_gen: v7x
topology: tpu7x:2x2x1
jax: 0.10.0
libtpu: 0.0.40
codegen_flags: <defaults>
</compile_context>

<pallas_src>
import math
import functools

import jax
import jax.numpy as jnp
from jax import lax
from jax.experimental import pallas as pl
from jax.experimental.pallas import tpu as pltpu


# ----------------------------- Pallas kernels ------------------------------

def _ssm_layer_kernel(*refs, seq_len, has_in_proj, has_out_proj):
    """Fused SSM layer:  out = MLP(LRU(u)) + u @ Wlin^T  (u = x @ Win^T if fused).

    refs = [x, t_idx, (Win^T), B_re^T, B_im^T, lam_re, lam_im, gamma,
            C_re^T, C_im^T, D^T, W1^T, W2^T, W3^T, Wlin^T, (Wout^T),
            out, state_re_scratch, state_im_scratch]
    Rows of x are (batch, time) flattened row-major, so time stride is 1 row.
    """
    o_ref, sre, sim = refs[-3], refs[-2], refs[-1]
    it = iter(refs[:-3])
    x_ref = next(it)
    t_ref = next(it)                                  # (rows, S) int32 time index
    win_ref = next(it) if has_in_proj else None
    bre_ref = next(it); bim_ref = next(it)
    lre_ref = next(it); lim_ref = next(it); gam_ref = next(it)
    cre_ref = next(it); cim_ref = next(it); d_ref = next(it)
    w1_ref = next(it); w2_ref = next(it); w3_ref = next(it); wl_ref = next(it)
    wout_ref = next(it) if has_out_proj else None

    x = x_ref[...]                                    # (rows, Fin)
    if has_in_proj:
        u = jnp.dot(x, win_ref[...], preferred_element_type=jnp.float32)
    else:
        u = x                                         # (rows, M)

    # --- input projection: GBU = gamma * (B @ u)  (complex, split re/im) ----
    gam = gam_ref[...]                                # (1, S)
    sre[...] = jnp.dot(u, bre_ref[...], preferred_element_type=jnp.float32) * gam
    sim[...] = jnp.dot(u, bim_ref[...], preferred_element_type=jnp.float32) * gam

    # --- log-step parallel scan:  x_t = lambda * x_{t-1} + GBU_t, x_{-1}=0 ---
    # ceil(log2(T)) passes; pass k adds lambda^k * state[t-k] for rows t >= k.
    rows = sre.shape[0]
    a_re = lre_ref[...]                               # lambda^k (1, S), starts at k=1
    a_im = lim_ref[...]
    k = 1
    while k < seq_len:                                # static Python loop
        n = rows - k
        prev_re = sre[pl.ds(0, n), :]
        prev_im = sim[pl.ds(0, n), :]
        cur_re = sre[pl.ds(k, n), :]
        cur_im = sim[pl.ds(k, n), :]
        valid = t_ref[pl.ds(k, n), :] >= k            # stay inside one batch element
        add_re = jnp.where(valid, a_re * prev_re - a_im * prev_im, 0.0)
        add_im = jnp.where(valid, a_re * prev_im + a_im * prev_re, 0.0)
        sre[pl.ds(k, n), :] = cur_re + add_re
        sim[pl.ds(k, n), :] = cur_im + add_im
        a_re, a_im = a_re * a_re - a_im * a_im, 2.0 * a_re * a_im
        k *= 2

    # --- readout: 2 * Re(C @ x) + D @ u -------------------------------------
    st_re = sre[...]
    st_im = sim[...]
    y = 2.0 * (jnp.dot(st_re, cre_ref[...], preferred_element_type=jnp.float32)
               - jnp.dot(st_im, cim_ref[...], preferred_element_type=jnp.float32))
    y = y + jnp.dot(u, d_ref[...], preferred_element_type=jnp.float32)

    # --- MLP (Lin -> SiLU -> Lin -> ReLU -> Lin) + linear skip ---------------
    z = jnp.dot(y, w1_ref[...], preferred_element_type=jnp.float32)
    z = z * (1.0 / (1.0 + jnp.exp(-z)))               # SiLU
    z = jnp.dot(z, w2_ref[...], preferred_element_type=jnp.float32)
    z = jnp.maximum(z, 0.0)                           # ReLU
    z = jnp.dot(z, w3_ref[...], preferred_element_type=jnp.float32)
    out = z + jnp.dot(u, wl_ref[...], preferred_element_type=jnp.float32)

    if has_out_proj:
        out = jnp.dot(out, wout_ref[...], preferred_element_type=jnp.float32)
    o_ref[...] = out


def _linear_kernel(x_ref, wt_ref, o_ref):
    o_ref[...] = jnp.dot(x_ref[...], wt_ref[...], preferred_element_type=jnp.float32)


# ------------------------------ JAX wrappers --------------------------------

def _linear(x2d, wt):
    """x2d: (R, IN); wt: (IN, OUT) -> (R, OUT).  Only used for the N==0 case."""
    R, IN = x2d.shape
    OUT = wt.shape[1]
    return pl.pallas_call(
        _linear_kernel,
        out_shape=jax.ShapeDtypeStruct((R, OUT), jnp.float32),
        grid=(1,),
        in_specs=[pl.BlockSpec((R, IN), lambda i: (0, 0)),
                  pl.BlockSpec((IN, OUT), lambda i: (0, 0))],
        out_specs=pl.BlockSpec((R, OUT), lambda i: (0, 0)),
    )(x2d, wt)


def _pick_batch_block(batch, seq_len, target_rows=512):
    """Largest divisor of `batch` whose block (bblk*T rows) stays <= target."""
    best = 1
    for d in range(1, batch + 1):
        if batch % d == 0 and d * seq_len <= target_rows:
            best = d
    return best


def _ssm_layer(x2d, lp, t_idx, *, seq_len, rows_per_block, win_t=None, wout_t=None):
    """One fused SSM layer on flattened (batch*seq, feature) rows."""
    R = x2d.shape[0]
    n_blocks = R // rows_per_block
    f_out = wout_t.shape[1] if wout_t is not None else lp['Wlin_t'].shape[1]
    s_dim = lp['Bre_t'].shape[1]

    inputs = [x2d, t_idx]
    in_specs = [
        pl.BlockSpec((rows_per_block, x2d.shape[1]), lambda i: (i, 0)),
        pl.BlockSpec(t_idx.shape, lambda i: (0, 0)),
    ]

    def add_full(arr):
        inputs.append(arr)
        in_specs.append(pl.BlockSpec(arr.shape, lambda i: (0, 0)))

    if win_t is not None:
        add_full(win_t)
    for name in ('Bre_t', 'Bim_t', 'lam_re', 'lam_im', 'gamma',
                 'Cre_t', 'Cim_t', 'D_t', 'W1_t', 'W2_t', 'W3_t', 'Wlin_t'):
        add_full(lp[name])
    if wout_t is not None:
        add_full(wout_t)

    kernel = functools.partial(
        _ssm_layer_kernel, seq_len=seq_len,
        has_in_proj=win_t is not None, has_out_proj=wout_t is not None)

    return pl.pallas_call(
        kernel,
        out_shape=jax.ShapeDtypeStruct((R, f_out), jnp.float32),
        grid=(n_blocks,),
        in_specs=in_specs,
        out_specs=pl.BlockSpec((rows_per_block, f_out), lambda i: (i, 0)),
        scratch_shapes=[pltpu.VMEM((rows_per_block, s_dim), jnp.float32),
                        pltpu.VMEM((rows_per_block, s_dim), jnp.float32)],
        compiler_params=pltpu.CompilerParams(
            dimension_semantics=("parallel",)),
    )(*inputs)


def deep_lru_forward(x, prepared):
    """x: (B, T, in_features) -> (B, T, out_features)."""
    B, T, _ = x.shape
    R = B * T
    h = x.reshape(R, -1)
    layers = prepared['layers']

    if not layers:                                   # degenerate: linin -> linout
        h = _linear(h, prepared['W_in_t'])
        h = _linear(h, prepared['W_out_t'])
        return h.reshape(B, T, -1)

    bblk = _pick_batch_block(B, T)
    rows_per_block = bblk * T
    s_dim = layers[0]['Bre_t'].shape[1]
    # per-row time index (same for every batch block) used to mask the scan
    t_idx = jnp.broadcast_to(
        jnp.tile(jnp.arange(T, dtype=jnp.int32), bblk)[:, None],
        (rows_per_block, s_dim))

    n_layers = len(layers)
    for li, lp in enumerate(layers):
        h = _ssm_layer(
            h, lp, t_idx, seq_len=T, rows_per_block=rows_per_block,
            win_t=prepared['W_in_t'] if li == 0 else None,
            wout_t=prepared['W_out_t'] if li == n_layers - 1 else None)
    # TODO(synk): for very long T that exceeds VMEM one would additionally
    # chunk the time axis with an "arbitrary" grid dim carrying boundary state.
    return h.reshape(B, T, -1)


def prepare_params(params):
    """One-time reparametrization: transpose weights, derive lambda/gamma."""
    prepared = {
        'W_in_t': jnp.transpose(params['W_in']).astype(jnp.float32),
        'W_out_t': jnp.transpose(params['W_out']).astype(jnp.float32),
        'layers': [],
    }
    for p in params['layers']:
        S = p['nu_log'].shape[0]
        lam_mod = jnp.exp(-jnp.exp(p['nu_log']))
        theta = jnp.exp(p['theta_log'])
        prepared['layers'].append(dict(
            Bre_t=jnp.transpose(p['B_re']).astype(jnp.float32),
            Bim_t=jnp.transpose(p['B_im']).astype(jnp.float32),
            lam_re=(lam_mod * jnp.cos(theta)).reshape(1, S).astype(jnp.float32),
            lam_im=(lam_mod * jnp.sin(theta)).reshape(1, S).astype(jnp.float32),
            gamma=jnp.exp(p['gamma_log']).reshape(1, S).astype(jnp.float32),
            Cre_t=jnp.transpose(p['C_re']).astype(jnp.float32),
            Cim_t=jnp.transpose(p['C_im']).astype(jnp.float32),
            D_t=jnp.transpose(p['D']).astype(jnp.float32),
            W1_t=jnp.transpose(p['W1']).astype(jnp.float32),
            W2_t=jnp.transpose(p['W2']).astype(jnp.float32),
            W3_t=jnp.transpose(p['W3']).astype(jnp.float32),
            Wlin_t=jnp.transpose(p['W_lin']).astype(jnp.float32),
        ))
    return prepared


# ---------------------------- parameter init --------------------------------

def _lin_init(key, out_dim, in_dim):
    bound = 1.0 / math.sqrt(in_dim)
    return jax.random.uniform(key, (out_dim, in_dim), jnp.float32,
                              minval=-bound, maxval=bound)


def _init_lru(key, in_f, out_f, state_f, rmin=0.9, rmax=1.0, max_phase=6.283):
    k = jax.random.split(key, 7)
    D = jax.random.normal(k[0], (out_f, in_f), jnp.float32) / math.sqrt(in_f)
    u1 = jax.random.uniform(k[1], (state_f,), jnp.float32)
    u2 = jax.random.uniform(k[2], (state_f,), jnp.float32)
    nu_log = jnp.log(-0.5 * jnp.log(u1 * (rmax + rmin) * (rmax - rmin) + rmin ** 2))
    theta_log = jnp.log(max_phase * u2)
    lam_mod = jnp.exp(-jnp.exp(nu_log))
    gamma_log = jnp.log(jnp.sqrt(1.0 - lam_mod ** 2))
    B_re = jax.random.normal(k[3], (state_f, in_f), jnp.float32) / math.sqrt(2 * in_f)
    B_im = jax.random.normal(k[4], (state_f, in_f), jnp.float32) / math.sqrt(2 * in_f)
    C_re = jax.random.normal(k[5], (out_f, state_f), jnp.float32) / math.sqrt(state_f)
    C_im = jax.random.normal(k[6], (out_f, state_f), jnp.float32) / math.sqrt(state_f)
    return dict(D=D, nu_log=nu_log, theta_log=theta_log, gamma_log=gamma_log,
                B_re=B_re, B_im=B_im, C_re=C_re, C_im=C_im)


def init_params(key, N, in_f, out_f, mid_f, state_f, mlp_hidden=30):
    keys = jax.random.split(key, N + 2)
    params = {
        'W_in': _lin_init(keys[0], mid_f, in_f),      # linin
        'W_out': _lin_init(keys[1], out_f, mid_f),    # linout
        'layers': [],
    }
    for j in range(N):
        lk = jax.random.split(keys[2 + j], 5)
        layer = _init_lru(lk[0], mid_f, mid_f, state_f)
        layer.update(
            W1=_lin_init(lk[1], mlp_hidden, mid_f),
            W2=_lin_init(lk[2], mlp_hidden, mlp_hidden),
            W3=_lin_init(lk[3], mid_f, mlp_hidden),
            W_lin=_lin_init(lk[4], mid_f, mid_f),
        )
        params['layers'].append(layer)
    return params


# ----------------------- pure-JAX reference (for checking) ------------------

def _reference_forward(x, params):
    h = x @ params['W_in'].T
    for p in params['layers']:
        u = h
        lam_mod = jnp.exp(-jnp.exp(p['nu_log']))
        theta = jnp.exp(p['theta_log'])
        lam_re = lam_mod * jnp.cos(theta)
        lam_im = lam_mod * jnp.sin(theta)
        gam = jnp.exp(p['gamma_log'])
        g_re = jnp.einsum('btm,sm->bts', u, p['B_re']) * gam
        g_im = jnp.einsum('btm,sm->bts', u, p['B_im']) * gam

        def step(carry, g):
            c_re, c_im = carry
            gr, gi = g
            n_re = lam_re * c_re - lam_im * c_im + gr
            n_im = lam_re * c_im + lam_im * c_re + gi
            return (n_re, n_im), (n_re, n_im)

        init = (jnp.zeros((x.shape[0], lam_re.shape[0]), jnp.float32),
                jnp.zeros((x.shape[0], lam_re.shape[0]), jnp.float32))
        gt = (jnp.swapaxes(g_re, 0, 1), jnp.swapaxes(g_im, 0, 1))     # (T,B,S)
        _, (st_re, st_im) = lax.scan(step, init, gt)
        st_re = jnp.swapaxes(st_re, 0, 1)
        st_im = jnp.swapaxes(st_im, 0, 1)
        y = 2.0 * (jnp.einsum('bts,os->bto', st_re, p['C_re'])
                   - jnp.einsum('bts,os->bto', st_im, p['C_im']))
        y = y + u @ p['D'].T
        z = y @ p['W1'].T
        z = z * jax.nn.sigmoid(z)
        z = jnp.maximum(z @ p['W2'].T, 0.0)
        z = z @ p['W3'].T
        h = z + u @ p['W_lin'].T
    return h @ params['W_out'].T


# --------------------------------- main --------------------------------------

if __name__ == "__main__":
    # small shapes: N=2 SSM layers, in=4, out=4, mid=32, state=32, batch=2, seq=8
    N, in_f, out_f, mid_f, state_f = 2, 4, 4, 32, 32
    B, T = 2, 8

    key = jax.random.PRNGKey(0)
    pkey, xkey = jax.random.split(key)
    params = init_params(pkey, N, in_f, out_f, mid_f, state_f)
    x = jax.random.normal(xkey, (B, T, in_f), dtype=jnp.float32)

    prepared = prepare_params(params)
    fwd = jax.jit(deep_lru_forward)
    out = jax.block_until_ready(fwd(x, prepared))

    assert out.shape == (B, T, out_f), out.shape
    assert out.dtype == jnp.float32

    ref = jax.block_until_ready(_reference_forward(x, params))
    max_err = float(jnp.max(jnp.abs(out - ref)))
    assert jnp.allclose(out, ref, rtol=2e-3, atol=2e-3), max_err

    print("KERNEL_OK")
</pallas_src>

<mosaic_0001>
module attributes {stable_mosaic.version = 11 : i64} {
  func.func @_ssm_layer_kernel(%arg0: i32, %arg1: memref<16x32xf32, #tpu.memory_space<vmem>>, %arg2: memref<16x32xi32, #tpu.memory_space<vmem>>, %arg3: memref<32x32xf32, #tpu.memory_space<vmem>>, %arg4: memref<32x32xf32, #tpu.memory_space<vmem>>, %arg5: memref<1x32xf32, #tpu.memory_space<vmem>>, %arg6: memref<1x32xf32, #tpu.memory_space<vmem>>, %arg7: memref<1x32xf32, #tpu.memory_space<vmem>>, %arg8: memref<32x32xf32, #tpu.memory_space<vmem>>, %arg9: memref<32x32xf32, #tpu.memory_space<vmem>>, %arg10: memref<32x32xf32, #tpu.memory_space<vmem>>, %arg11: memref<32x30xf32, #tpu.memory_space<vmem>>, %arg12: memref<30x30xf32, #tpu.memory_space<vmem>>, %arg13: memref<30x32xf32, #tpu.memory_space<vmem>>, %arg14: memref<32x32xf32, #tpu.memory_space<vmem>>, %arg15: memref<32x4xf32, #tpu.memory_space<vmem>>, %arg16: memref<16x4xf32, #tpu.memory_space<vmem>>, %arg17: memref<16x32xf32, #tpu.memory_space<vmem>>, %arg18: memref<16x32xf32, #tpu.memory_space<vmem>>) attributes {dimension_semantics = [#tpu.dimension_semantics<parallel>], iteration_bounds = array<i64: 1>, scalar_prefetch = 0 : i64, scratch_operands = 2 : i64, tpu.core_type = #tpu.core_type<tc>, window_params = [{transform_indices = @transform_0, window_bounds = array<i64: 16, 32>}, {pipeline_mode = #tpu.pipeline_mode<synchronous>, transform_indices = @transform_1, window_bounds = array<i64: 16, 32>}, {pipeline_mode = #tpu.pipeline_mode<synchronous>, transform_indices = @transform_2, window_bounds = array<i64: 32, 32>}, {pipeline_mode = #tpu.pipeline_mode<synchronous>, transform_indices = @transform_3, window_bounds = array<i64: 32, 32>}, {pipeline_mode = #tpu.pipeline_mode<synchronous>, transform_indices = @transform_4, window_bounds = array<i64: 1, 32>}, {pipeline_mode = #tpu.pipeline_mode<synchronous>, transform_indices = @transform_5, window_bounds = array<i64: 1, 32>}, {pipeline_mode = #tpu.pipeline_mode<synchronous>, transform_indices = @transform_6, window_bounds = array<i64: 1, 32>}, {pipeline_mode = #tpu.pipeline_mode<synchronous>, transform_indices = @transform_7, window_bounds = array<i64: 32, 32>}, {pipeline_mode = #tpu.pipeline_mode<synchronous>, transform_indices = @transform_8, window_bounds = array<i64: 32, 32>}, {pipeline_mode = #tpu.pipeline_mode<synchronous>, transform_indices = @transform_9, window_bounds = array<i64: 32, 32>}, {pipeline_mode = #tpu.pipeline_mode<synchronous>, transform_indices = @transform_10, window_bounds = array<i64: 32, 30>}, {pipeline_mode = #tpu.pipeline_mode<synchronous>, transform_indices = @transform_11, window_bounds = array<i64: 30, 30>}, {pipeline_mode = #tpu.pipeline_mode<synchronous>, transform_indices = @transform_12, window_bounds = array<i64: 30, 32>}, {pipeline_mode = #tpu.pipeline_mode<synchronous>, transform_indices = @transform_13, window_bounds = array<i64: 32, 32>}, {pipeline_mode = #tpu.pipeline_mode<synchronous>, transform_indices = @transform_14, window_bounds = array<i64: 32, 4>}, {transform_indices = @transform_15, window_bounds = array<i64: 16, 4>}]} {
    %c0 = arith.constant 0 : index
    %c0_0 = arith.constant 0 : index
    %0 = vector.load %arg1[%c0, %c0_0] : memref<16x32xf32, #tpu.memory_space<vmem>>, vector<16x32xf32>
    %c0_1 = arith.constant 0 : index
    %c0_2 = arith.constant 0 : index
    %1 = vector.load %arg7[%c0_1, %c0_2] : memref<1x32xf32, #tpu.memory_space<vmem>>, vector<1x32xf32>
    %c0_3 = arith.constant 0 : index
    %c0_4 = arith.constant 0 : index
    %2 = vector.load %arg3[%c0_3, %c0_4] : memref<32x32xf32, #tpu.memory_space<vmem>>, vector<32x32xf32>
    %cst = arith.constant dense<0.000000e+00> : vector<16x32xf32>
    %3 = tpu.matmul %0, %2, %cst {dimension_numbers = #tpu.dot_dimension_numbers<[1], [0], [0], [1], [0, 0, 1, 1], [], []>} : vector<16x32xf32>, vector<32x32xf32>, vector<16x32xf32> -> vector<16x32xf32>
    %4 = vector.broadcast %1 : vector<1x32xf32> to vector<16x32xf32>
    %5 = arith.mulf %3, %4 : vector<16x32xf32>
    %c0_5 = arith.constant 0 : index
    %c0_6 = arith.constant 0 : index
    %6 = vector.load %arg17[%c0_5, %c0_6] : memref<16x32xf32, #tpu.memory_space<vmem>>, vector<16x32xf32>
    tpu.vector_store %arg17[%c0_5, %c0_6], %5 {strides = array<i32>} : memref<16x32xf32, #tpu.memory_space<vmem>>, vector<16x32xf32>,
    %c0_7 = arith.constant 0 : index
    %c0_8 = arith.constant 0 : index
    %7 = vector.load %arg4[%c0_7, %c0_8] : memref<32x32xf32, #tpu.memory_space<vmem>>, vector<32x32xf32>
    %cst_9 = arith.constant dense<0.000000e+00> : vector<16x32xf32>
    %8 = tpu.matmul %0, %7, %cst_9 {dimension_numbers = #tpu.dot_dimension_numbers<[1], [0], [0], [1], [0, 0, 1, 1], [], []>} : vector<16x32xf32>, vector<32x32xf32>, vector<16x32xf32> -> vector<16x32xf32>
    %9 = vector.broadcast %1 : vector<1x32xf32> to vector<16x32xf32>
    %10 = arith.mulf %8, %9 : vector<16x32xf32>
    %c0_10 = arith.constant 0 : index
    %c0_11 = arith.constant 0 : index
    %11 = vector.load %arg18[%c0_10, %c0_11] : memref<16x32xf32, #tpu.memory_space<vmem>>, vector<16x32xf32>
    tpu.vector_store %arg18[%c0_10, %c0_11], %10 {strides = array<i32>} : memref<16x32xf32, #tpu.memory_space<vmem>>, vector<16x32xf32>,
    %c0_12 = arith.constant 0 : index
    %c0_13 = arith.constant 0 : index
    %12 = vector.load %arg5[%c0_12, %c0_13] : memref<1x32xf32, #tpu.memory_space<vmem>>, vector<1x32xf32>
    %c0_14 = arith.constant 0 : index
    %c0_15 = arith.constant 0 : index
    %13 = vector.load %arg6[%c0_14, %c0_15] : memref<1x32xf32, #tpu.memory_space<vmem>>, vector<1x32xf32>
    %c0_16 = arith.constant 0 : index
    %c0_17 = arith.constant 0 : index
    %14 = vector.load %arg17[%c0_16, %c0_17] : memref<16x32xf32, #tpu.memory_space<vmem>>, vector<15x32xf32>
    %c0_18 = arith.constant 0 : index
    %c0_19 = arith.constant 0 : index
    %15 = vector.load %arg18[%c0_18, %c0_19] : memref<16x32xf32, #tpu.memory_space<vmem>>, vector<15x32xf32>
    %c1 = arith.constant 1 : index
    %c0_20 = arith.constant 0 : index
    %16 = vector.load %arg17[%c1, %c0_20] : memref<16x32xf32, #tpu.memory_space<vmem>>, vector<15x32xf32>
    %c1_21 = arith.constant 1 : index
    %c0_22 = arith.constant 0 : index
    %17 = vector.load %arg18[%c1_21, %c0_22] : memref<16x32xf32, #tpu.memory_space<vmem>>, vector<15x32xf32>
    %c1_23 = arith.constant 1 : index
    %c0_24 = arith.constant 0 : index
    %18 = vector.load %arg2[%c1_23, %c0_24] : memref<16x32xi32, #tpu.memory_space<vmem>>, vector<15x32xi32>
    %c1_i32 = arith.constant 1 : i32
    %19 = vector.broadcast %c1_i32 : i32 to vector<15x32xi32>
    %20 = arith.cmpi sge, %18, %19 : vector<15x32xi32>
    %21 = vector.broadcast %12 : vector<1x32xf32> to vector<15x32xf32>
    %22 = arith.mulf %21, %14 : vector<15x32xf32>
    %23 = vector.broadcast %13 : vector<1x32xf32> to vector<15x32xf32>
    %24 = arith.mulf %23, %15 : vector<15x32xf32>
    %25 = arith.subf %22, %24 : vector<15x32xf32>
    %cst_25 = arith.constant 0.000000e+00 : f32
    %26 = vector.broadcast %cst_25 : f32 to vector<15x32xf32>
    %27 = arith.select %20, %25, %26 : vector<15x32xi1>, vector<15x32xf32>
    %28 = vector.broadcast %12 : vector<1x32xf32> to vector<15x32xf32>
    %29 = arith.mulf %28, %15 : vector<15x32xf32>
    %30 = vector.broadcast %13 : vector<1x32xf32> to vector<15x32xf32>
    %31 = arith.mulf %30, %14 : vector<15x32xf32>
    %32 = arith.addf %29, %31 : vector<15x32xf32>
    %cst_26 = arith.constant 0.000000e+00 : f32
    %33 = vector.broadcast %cst_26 : f32 to vector<15x32xf32>
    %34 = arith.select %20, %32, %33 : vector<15x32xi1>, vector<15x32xf32>
    %35 = arith.addf %16, %27 : vector<15x32xf32>
    %c1_27 = arith.constant 1 : index
    %c0_28 = arith.constant 0 : index
    %36 = vector.load %arg17[%c1_27, %c0_28] : memref<16x32xf32, #tpu.memory_space<vmem>>, vector<15x32xf32>
    tpu.vector_store %arg17[%c1_27, %c0_28], %35 {strides = array<i32>} : memref<16x32xf32, #tpu.memory_space<vmem>>, vector<15x32xf32>,
    %37 = arith.addf %17, %34 : vector<15x32xf32>
    %c1_29 = arith.constant 1 : index
    %c0_30 = arith.constant 0 : index
    %38 = vector.load %arg18[%c1_29, %c0_30] : memref<16x32xf32, #tpu.memory_space<vmem>>, vector<15x32xf32>
    tpu.vector_store %arg18[%c1_29, %c0_30], %37 {strides = array<i32>} : memref<16x32xf32, #tpu.memory_space<vmem>>, vector<15x32xf32>,
    %39 = arith.mulf %12, %12 : vector<1x32xf32>
    %40 = arith.mulf %13, %13 : vector<1x32xf32>
    %41 = arith.subf %39, %40 : vector<1x32xf32>
    %cst_31 = arith.constant 2.000000e+00 : f32
    %42 = vector.broadcast %cst_31 : f32 to vector<1x32xf32>
    %43 = arith.mulf %42, %12 : vector<1x32xf32>
    %44 = arith.mulf %43, %13 : vector<1x32xf32>
    %c0_32 = arith.constant 0 : index
    %c0_33 = arith.constant 0 : index
    %45 = vector.load %arg17[%c0_32, %c0_33] : memref<16x32xf32, #tpu.memory_space<vmem>>, vector<14x32xf32>
    %c0_34 = arith.constant 0 : index
    %c0_35 = arith.constant 0 : index
    %46 = vector.load %arg18[%c0_34, %c0_35] : memref<16x32xf32, #tpu.memory_space<vmem>>, vector<14x32xf32>
    %c2 = arith.constant 2 : index
    %c0_36 = arith.constant 0 : index
    %47 = vector.load %arg17[%c2, %c0_36] : memref<16x32xf32, #tpu.memory_space<vmem>>, vector<14x32xf32>
    %c2_37 = arith.constant 2 : index
    %c0_38 = arith.constant 0 : index
    %48 = vector.load %arg18[%c2_37, %c0_38] : memref<16x32xf32, #tpu.memory_space<vmem>>, vector<14x32xf32>
    %c2_39 = arith.constant 2 : index
    %c0_40 = arith.constant 0 : index
    %49 = vector.load %arg2[%c2_39, %c0_40] : memref<16x32xi32, #tpu.memory_space<vmem>>, vector<14x32xi32>
    %c2_i32 = arith.constant 2 : i32
    %50 = vector.broadcast %c2_i32 : i32 to vector<14x32xi32>
    %51 = arith.cmpi sge, %49, %50 : vector<14x32xi32>
    %52 = vector.broadcast %41 : vector<1x32xf32> to vector<14x32xf32>
    %53 = arith.mulf %52, %45 : vector<14x32xf32>
    %54 = vector.broadcast %44 : vector<1x32xf32> to vector<14x32xf32>
    %55 = arith.mulf %54, %46 : vector<14x32xf32>
    %56 = arith.subf %53, %55 : vector<14x32xf32>
    %cst_41 = arith.constant 0.000000e+00 : f32
    %57 = vector.broadcast %cst_41 : f32 to vector<14x32xf32>
    %58 = arith.select %51, %56, %57 : vector<14x32xi1>, vector<14x32xf32>
    %59 = vector.broadcast %41 : vector<1x32xf32> to vector<14x32xf32>
    %60 = arith.mulf %59, %46 : vector<14x32xf32>
    %61 = vector.broadcast %44 : vector<1x32xf32> to vector<14x32xf32>
    %62 = arith.mulf %61, %45 : vector<14x32xf32>
    %63 = arith.addf %60, %62 : vector<14x32xf32>
    %cst_42 = arith.constant 0.000000e+00 : f32
    %64 = vector.broadcast %cst_42 : f32 to vector<14x32xf32>
    %65 = arith.select %51, %63, %64 : vector<14x32xi1>, vector<14x32xf32>
    %66 = arith.addf %47, %58 : vector<14x32xf32>
    %c2_43 = arith.constant 2 : index
    %c0_44 = arith.constant 0 : index
    %67 = vector.load %arg17[%c2_43, %c0_44] : memref<16x32xf32, #tpu.memory_space<vmem>>, vector<14x32xf32>
    tpu.vector_store %arg17[%c2_43, %c0_44], %66 {strides = array<i32>} : memref<16x32xf32, #tpu.memory_space<vmem>>, vector<14x32xf32>,
    %68 = arith.addf %48, %65 : vector<14x32xf32>
    %c2_45 = arith.constant 2 : index
    %c0_46 = arith.constant 0 : index
    %69 = vector.load %arg18[%c2_45, %c0_46] : memref<16x32xf32, #tpu.memory_space<vmem>>, vector<14x32xf32>
    tpu.vector_store %arg18[%c2_45, %c0_46], %68 {strides = array<i32>} : memref<16x32xf32, #tpu.memory_space<vmem>>, vector<14x32xf32>,
    %70 = arith.mulf %41, %41 : vector<1x32xf32>
    %71 = arith.mulf %44, %44 : vector<1x32xf32>
    %72 = arith.subf %70, %71 : vector<1x32xf32>
    %cst_47 = arith.constant 2.000000e+00 : f32
    %73 = vector.broadcast %cst_47 : f32 to vector<1x32xf32>
    %74 = arith.mulf %73, %41 : vector<1x32xf32>
    %75 = arith.mulf %74, %44 : vector<1x32xf32>
    %c0_48 = arith.constant 0 : index
    %c0_49 = arith.constant 0 : index
    %76 = vector.load %arg17[%c0_48, %c0_49] : memref<16x32xf32, #tpu.memory_space<vmem>>, vector<12x32xf32>
    %c0_50 = arith.constant 0 : index
    %c0_51 = arith.constant 0 : index
    %77 = vector.load %arg18[%c0_50, %c0_51] : memref<16x32xf32, #tpu.memory_space<vmem>>, vector<12x32xf32>
    %c4 = arith.constant 4 : index
    %c0_52 = arith.constant 0 : index
    %78 = vector.load %arg17[%c4, %c0_52] : memref<16x32xf32, #tpu.memory_space<vmem>>, vector<12x32xf32>
    %c4_53 = arith.constant 4 : index
    %c0_54 = arith.constant 0 : index
    %79 = vector.load %arg18[%c4_53, %c0_54] : memref<16x32xf32, #tpu.memory_space<vmem>>, vector<12x32xf32>
    %c4_55 = arith.constant 4 : index
    %c0_56 = arith.constant 0 : index
    %80 = vector.load %arg2[%c4_55, %c0_56] : memref<16x32xi32, #tpu.memory_space<vmem>>, vector<12x32xi32>
    %c4_i32 = arith.constant 4 : i32
    %81 = vector.broadcast %c4_i32 : i32 to vector<12x32xi32>
    %82 = arith.cmpi sge, %80, %81 : vector<12x32xi32>
    %83 = vector.broadcast %72 : vector<1x32xf32> to vector<12x32xf32>
    %84 = arith.mulf %83, %76 : vector<12x32xf32>
    %85 = vector.broadcast %75 : vector<1x32xf32> to vector<12x32xf32>
    %86 = arith.mulf %85, %77 : vector<12x32xf32>
    %87 = arith.subf %84, %86 : vector<12x32xf32>
    %cst_57 = arith.constant 0.000000e+00 : f32
    %88 = vector.broadcast %cst_57 : f32 to vector<12x32xf32>
    %89 = arith.select %82, %87, %88 : vector<12x32xi1>, vector<12x32xf32>
    %90 = vector.broadcast %72 : vector<1x32xf32> to vector<12x32xf32>
    %91 = arith.mulf %90, %77 : vector<12x32xf32>
    %92 = vector.broadcast %75 : vector<1x32xf32> to vector<12x32xf32>
    %93 = arith.mulf %92, %76 : vector<12x32xf32>
    %94 = arith.addf %91, %93 : vector<12x32xf32>
    %cst_58 = arith.constant 0.000000e+00 : f32
    %95 = vector.broadcast %cst_58 : f32 to vector<12x32xf32>
    %96 = arith.select %82, %94, %95 : vector<12x32xi1>, vector<12x32xf32>
    %97 = arith.addf %78, %89 : vector<12x32xf32>
    %c4_59 = arith.constant 4 : index
    %c0_60 = arith.constant 0 : index
    %98 = vector.load %arg17[%c4_59, %c0_60] : memref<16x32xf32, #tpu.memory_space<vmem>>, vector<12x32xf32>
    tpu.vector_store %arg17[%c4_59, %c0_60], %97 {strides = array<i32>} : memref<16x32xf32, #tpu.memory_space<vmem>>, vector<12x32xf32>,
    %99 = arith.addf %79, %96 : vector<12x32xf32>
    %c4_61 = arith.constant 4 : index
    %c0_62 = arith.constant 0 : index
    %100 = vector.load %arg18[%c4_61, %c0_62] : memref<16x32xf32, #tpu.memory_space<vmem>>, vector<12x32xf32>
    tpu.vector_store %arg18[%c4_61, %c0_62], %99 {strides = array<i32>} : memref<16x32xf32, #tpu.memory_space<vmem>>, vector<12x32xf32>,
    %c0_63 = arith.constant 0 : index
    %c0_64 = arith.constant 0 : index
    %101 = vector.load %arg17[%c0_63, %c0_64] : memref<16x32xf32, #tpu.memory_space<vmem>>, vector<16x32xf32>
    %c0_65 = arith.constant 0 : index
    %c0_66 = arith.constant 0 : index
    %102 = vector.load %arg18[%c0_65, %c0_66] : memref<16x32xf32, #tpu.memory_space<vmem>>, vector<16x32xf32>
    %c0_67 = arith.constant 0 : index
    %c0_68 = arith.constant 0 : index
    %103 = vector.load %arg8[%c0_67, %c0_68] : memref<32x32xf32, #tpu.memory_space<vmem>>, vector<32x32xf32>
    %cst_69 = arith.constant dense<0.000000e+00> : vector<16x32xf32>
    %104 = tpu.matmul %101, %103, %cst_69 {dimension_numbers = #tpu.dot_dimension_numbers<[1], [0], [0], [1], [0, 0, 1, 1], [], []>} : vector<16x32xf32>, vector<32x32xf32>, vector<16x32xf32> -> vector<16x32xf32>
    %c0_70 = arith.constant 0 : index
    %c0_71 = arith.constant 0 : index
    %105 = vector.load %arg9[%c0_70, %c0_71] : memref<32x32xf32, #tpu.memory_space<vmem>>, vector<32x32xf32>
    %cst_72 = arith.constant dense<0.000000e+00> : vector<16x32xf32>
    %106 = tpu.matmul %102, %105, %cst_72 {dimension_numbers = #tpu.dot_dimension_numbers<[1], [0], [0], [1], [0, 0, 1, 1], [], []>} : vector<16x32xf32>, vector<32x32xf32>, vector<16x32xf32> -> vector<16x32xf32>
    %107 = arith.subf %104, %106 : vector<16x32xf32>
    %cst_73 = arith.constant 2.000000e+00 : f32
    %108 = vector.broadcast %cst_73 : f32 to vector<16x32xf32>
    %109 = arith.mulf %108, %107 : vector<16x32xf32>
    %c0_74 = arith.constant 0 : index
    %c0_75 = arith.constant 0 : index
    %110 = vector.load %arg10[%c0_74, %c0_75] : memref<32x32xf32, #tpu.memory_space<vmem>>, vector<32x32xf32>
    %cst_76 = arith.constant dense<0.000000e+00> : vector<16x32xf32>
    %111 = tpu.matmul %0, %110, %cst_76 {dimension_numbers = #tpu.dot_dimension_numbers<[1], [0], [0], [1], [0, 0, 1, 1], [], []>} : vector<16x32xf32>, vector<32x32xf32>, vector<16x32xf32> -> vector<16x32xf32>
    %112 = arith.addf %109, %111 : vector<16x32xf32>
    %c0_77 = arith.constant 0 : index
    %c0_78 = arith.constant 0 : index
    %113 = vector.load %arg11[%c0_77, %c0_78] : memref<32x30xf32, #tpu.memory_space<vmem>>, vector<32x30xf32>
    %cst_79 = arith.constant dense<0.000000e+00> : vector<16x30xf32>
    %114 = tpu.matmul %112, %113, %cst_79 {dimension_numbers = #tpu.dot_dimension_numbers<[1], [0], [0], [1], [0, 0, 1, 1], [], []>} : vector<16x32xf32>, vector<32x30xf32>, vector<16x30xf32> -> vector<16x30xf32>
    %cst_80 = arith.constant 0.000000e+00 : f32
    %115 = vector.broadcast %cst_80 : f32 to vector<16x30xf32>
    %116 = arith.subf %115, %114 : vector<16x30xf32>
    %117 = math.exp %116 : vector<16x30xf32>
    %cst_81 = arith.constant 1.000000e+00 : f32
    %118 = vector.broadcast %cst_81 : f32 to vector<16x30xf32>
    %119 = arith.addf %118, %117 : vector<16x30xf32>
    %cst_82 = arith.constant 1.000000e+00 : f32
    %120 = vector.broadcast %cst_82 : f32 to vector<16x30xf32>
    %121 = arith.divf %120, %119 : vector<16x30xf32>
    %122 = arith.mulf %114, %121 : vector<16x30xf32>
    %c0_83 = arith.constant 0 : index
    %c0_84 = arith.constant 0 : index
    %123 = vector.load %arg12[%c0_83, %c0_84] : memref<30x30xf32, #tpu.memory_space<vmem>>, vector<30x30xf32>
    %cst_85 = arith.constant dense<0.000000e+00> : vector<16x30xf32>
    %124 = tpu.matmul %122, %123, %cst_85 {dimension_numbers = #tpu.dot_dimension_numbers<[1], [0], [0], [1], [0, 0, 1, 1], [], []>} : vector<16x30xf32>, vector<30x30xf32>, vector<16x30xf32> -> vector<16x30xf32>
    %cst_86 = arith.constant 0.000000e+00 : f32
    %125 = vector.broadcast %cst_86 : f32 to vector<16x30xf32>
    %126 = arith.maximumf %124, %125 : vector<16x30xf32>
    %c0_87 = arith.constant 0 : index
    %c0_88 = arith.constant 0 : index
    %127 = vector.load %arg13[%c0_87, %c0_88] : memref<30x32xf32, #tpu.memory_space<vmem>>, vector<30x32xf32>
    %cst_89 = arith.constant dense<0.000000e+00> : vector<16x32xf32>
    %128 = tpu.matmul %126, %127, %cst_89 {dimension_numbers = #tpu.dot_dimension_numbers<[1], [0], [0], [1], [0, 0, 1, 1], [], []>} : vector<16x30xf32>, vector<30x32xf32>, vector<16x32xf32> -> vector<16x32xf32>
    %c0_90 = arith.constant 0 : index
    %c0_91 = arith.constant 0 : index
    %129 = vector.load %arg14[%c0_90, %c0_91] : memref<32x32xf32, #tpu.memory_space<vmem>>, vector<32x32xf32>
    %cst_92 = arith.constant dense<0.000000e+00> : vector<16x32xf32>
    %130 = tpu.matmul %0, %129, %cst_92 {dimension_numbers = #tpu.dot_dimension_numbers<[1], [0], [0], [1], [0, 0, 1, 1], [], []>} : vector<16x32xf32>, vector<32x32xf32>, vector<16x32xf32> -> vector<16x32xf32>
    %131 = arith.addf %128, %130 : vector<16x32xf32>
    %c0_93 = arith.constant 0 : index
    %c0_94 = arith.constant 0 : index
    %132 = vector.load %arg15[%c0_93, %c0_94] : memref<32x4xf32, #tpu.memory_space<vmem>>, vector<32x4xf32>
    %cst_95 = arith.constant dense<0.000000e+00> : vector<16x4xf32>
    %133 = tpu.matmul %131, %132, %cst_95 {dimension_numbers = #tpu.dot_dimension_numbers<[1], [0], [0], [1], [0, 0, 1, 1], [], []>} : vector<16x32xf32>, vector<32x4xf32>, vector<16x4xf32> -> vector<16x4xf32>
    %c0_96 = arith.constant 0 : index
    %c0_97 = arith.constant 0 : index
    %134 = vector.load %arg16[%c0_96, %c0_97] : memref<16x4xf32, #tpu.memory_space<vmem>>, vector<16x4xf32>
    tpu.vector_store %arg16[%c0_96, %c0_97], %133 {strides = array<i32>} : memref<16x4xf32, #tpu.memory_space<vmem>>, vector<16x4xf32>,
    return
  }
  func.func @transform_0(%arg0: i32) -> (i32, i32) {
    %c0_i32 = arith.constant 0 : i32
    %c0_i32_0 = arith.constant 0 : i32
    return %arg0, %c0_i32 : i32, i32
  }
  func.func @transform_1(%arg0: i32) -> (i32, i32) {
    %c0_i32 = arith.constant 0 : i32
    %c0_i32_0 = arith.constant 0 : i32
    %c0_i32_1 = arith.constant 0 : i32
    return %c0_i32, %c0_i32_0 : i32, i32
  }
  func.func @transform_2(%arg0: i32) -> (i32, i32) {
    %c0_i32 = arith.constant 0 : i32
    %c0_i32_0 = arith.constant 0 : i32
    %c0_i32_1 = arith.constant 0 : i32
    return %c0_i32, %c0_i32_0 : i32, i32
  }
  func.func @transform_3(%arg0: i32) -> (i32, i32) {
    %c0_i32 = arith.constant 0 : i32
    %c0_i32_0 = arith.constant 0 : i32
    %c0_i32_1 = arith.constant 0 : i32
    return %c0_i32, %c0_i32_0 : i32, i32
  }
  func.func @transform_4(%arg0: i32) -> (i32, i32) {
    %c0_i32 = arith.constant 0 : i32
    %c0_i32_0 = arith.constant 0 : i32
    %c0_i32_1 = arith.constant 0 : i32
    return %c0_i32, %c0_i32_0 : i32, i32
  }
  func.func @transform_5(%arg0: i32) -> (i32, i32) {
    %c0_i32 = arith.constant 0 : i32
    %c0_i32_0 = arith.constant 0 : i32
    %c0_i32_1 = arith.constant 0 : i32
    return %c0_i32, %c0_i32_0 : i32, i32
  }
  func.func @transform_6(%arg0: i32) -> (i32, i32) {
    %c0_i32 = arith.constant 0 : i32
    %c0_i32_0 = arith.constant 0 : i32
    %c0_i32_1 = arith.constant 0 : i32
    return %c0_i32, %c0_i32_0 : i32, i32
  }
  func.func @transform_7(%arg0: i32) -> (i32, i32) {
    %c0_i32 = arith.constant 0 : i32
    %c0_i32_0 = arith.constant 0 : i32
    %c0_i32_1 = arith.constant 0 : i32
    return %c0_i32, %c0_i32_0 : i32, i32
  }
  func.func @transform_8(%arg0: i32) -> (i32, i32) {
    %c0_i32 = arith.constant 0 : i32
    %c0_i32_0 = arith.constant 0 : i32
    %c0_i32_1 = arith.constant 0 : i32
    return %c0_i32, %c0_i32_0 : i32, i32
  }
  func.func @transform_9(%arg0: i32) -> (i32, i32) {
    %c0_i32 = arith.constant 0 : i32
    %c0_i32_0 = arith.constant 0 : i32
    %c0_i32_1 = arith.constant 0 : i32
    return %c0_i32, %c0_i32_0 : i32, i32
  }
  func.func @transform_10(%arg0: i32) -> (i32, i32) {
    %c0_i32 = arith.constant 0 : i32
    %c0_i32_0 = arith.constant 0 : i32
    %c0_i32_1 = arith.constant 0 : i32
    return %c0_i32, %c0_i32_0 : i32, i32
  }
  func.func @transform_11(%arg0: i32) -> (i32, i32) {
    %c0_i32 = arith.constant 0 : i32
    %c0_i32_0 = arith.constant 0 : i32
    %c0_i32_1 = arith.constant 0 : i32
    return %c0_i32, %c0_i32_0 : i32, i32
  }
  func.func @transform_12(%arg0: i32) -> (i32, i32) {
    %c0_i32 = arith.constant 0 : i32
    %c0_i32_0 = arith.constant 0 : i32
    %c0_i32_1 = arith.constant 0 : i32
    return %c0_i32, %c0_i32_0 : i32, i32
  }
  func.func @transform_13(%arg0: i32) -> (i32, i32) {
    %c0_i32 = arith.constant 0 : i32
    %c0_i32_0 = arith.constant 0 : i32
    %c0_i32_1 = arith.constant 0 : i32
    return %c0_i32, %c0_i32_0 : i32, i32
  }
  func.func @transform_14(%arg0: i32) -> (i32, i32) {
    %c0_i32 = arith.constant 0 : i32
    %c0_i32_0 = arith.constant 0 : i32
    %c0_i32_1 = arith.constant 0 : i32
    return %c0_i32, %c0_i32_0 : i32, i32
  }
  func.func @transform_15(%arg0: i32) -> (i32, i32) {
    %c0_i32 = arith.constant 0 : i32
    %c0_i32_0 = arith.constant 0 : i32
    return %arg0, %c0_i32 : i32, i32
  }
}

module attributes {stable_mosaic.version = 11 : i64} {
  func.func @_ssm_layer_kernel(%arg0: i32, %arg1: memref<16x4xf32, #tpu.memory_space<vmem>>, %arg2: memref<16x32xi32, #tpu.memory_space<vmem>>, %arg3: memref<4x32xf32, #tpu.memory_space<vmem>>, %arg4: memref<32x32xf32, #tpu.memory_space<vmem>>, %arg5: memref<32x32xf32, #tpu.memory_space<vmem>>, %arg6: memref<1x32xf32, #tpu.memory_space<vmem>>, %arg7: memref<1x32xf32, #tpu.memory_space<vmem>>, %arg8: memref<1x32xf32, #tpu.memory_space<vmem>>, %arg9: memref<32x32xf32, #tpu.memory_space<vmem>>, %arg10: memref<32x32xf32, #tpu.memory_space<vmem>>, %arg11: memref<32x32xf32, #tpu.memory_space<vmem>>, %arg12: memref<32x30xf32, #tpu.memory_space<vmem>>, %arg13: memref<30x30xf32, #tpu.memory_space<vmem>>, %arg14: memref<30x32xf32, #tpu.memory_space<vmem>>, %arg15: memref<32x32xf32, #tpu.memory_space<vmem>>, %arg16: memref<16x32xf32, #tpu.memory_space<vmem>>, %arg17: memref<16x32xf32, #tpu.memory_space<vmem>>, %arg18: memref<16x32xf32, #tpu.memory_space<vmem>>) attributes {dimension_semantics = [#tpu.dimension_semantics<parallel>], iteration_bounds = array<i64: 1>, scalar_prefetch = 0 : i64, scratch_operands = 2 : i64, tpu.core_type = #tpu.core_type<tc>, window_params = [{transform_indices = @transform_0, window_bounds = array<i64: 16, 4>}, {pipeline_mode = #tpu.pipeline_mode<synchronous>, transform_indices = @transform_1, window_bounds = array<i64: 16, 32>}, {pipeline_mode = #tpu.pipeline_mode<synchronous>, transform_indices = @transform_2, window_bounds = array<i64: 4, 32>}, {pipeline_mode = #tpu.pipeline_mode<synchronous>, transform_indices = @transform_3, window_bounds = array<i64: 32, 32>}, {pipeline_mode = #tpu.pipeline_mode<synchronous>, transform_indices = @transform_4, window_bounds = array<i64: 32, 32>}, {pipeline_mode = #tpu.pipeline_mode<synchronous>, transform_indices = @transform_5, window_bounds = array<i64: 1, 32>}, {pipeline_mode = #tpu.pipeline_mode<synchronous>, transform_indices = @transform_6, window_bounds = array<i64: 1, 32>}, {pipeline_mode = #tpu.pipeline_mode<synchronous>, transform_indices = @transform_7, window_bounds = array<i64: 1, 32>}, {pipeline_mode = #tpu.pipeline_mode<synchronous>, transform_indices = @transform_8, window_bounds = array<i64: 32, 32>}, {pipeline_mode = #tpu.pipeline_mode<synchronous>, transform_indices = @transform_9, window_bounds = array<i64: 32, 32>}, {pipeline_mode = #tpu.pipeline_mode<synchronous>, transform_indices = @transform_10, window_bounds = array<i64: 32, 32>}, {pipeline_mode = #tpu.pipeline_mode<synchronous>, transform_indices = @transform_11, window_bounds = array<i64: 32, 30>}, {pipeline_mode = #tpu.pipeline_mode<synchronous>, transform_indices = @transform_12, window_bounds = array<i64: 30, 30>}, {pipeline_mode = #tpu.pipeline_mode<synchronous>, transform_indices = @transform_13, window_bounds = array<i64: 30, 32>}, {pipeline_mode = #tpu.pipeline_mode<synchronous>, transform_indices = @transform_14, window_bounds = array<i64: 32, 32>}, {transform_indices = @transform_15, window_bounds = array<i64: 16, 32>}]} {
    %c0 = arith.constant 0 : index
    %c0_0 = arith.constant 0 : index
    %0 = vector.load %arg1[%c0, %c0_0] : memref<16x4xf32, #tpu.memory_space<vmem>>, vector<16x4xf32>
    %c0_1 = arith.constant 0 : index
    %c0_2 = arith.constant 0 : index
    %1 = vector.load %arg3[%c0_1, %c0_2] : memref<4x32xf32, #tpu.memory_space<vmem>>, vector<4x32xf32>
    %cst = arith.constant dense<0.000000e+00> : vector<16x32xf32>
    %2 = tpu.matmul %0, %1, %cst {dimension_numbers = #tpu.dot_dimension_numbers<[1], [0], [0], [1], [0, 0, 1, 1], [], []>} : vector<16x4xf32>, vector<4x32xf32>, vector<16x32xf32> -> vector<16x32xf32>
    %c0_3 = arith.constant 0 : index
    %c0_4 = arith.constant 0 : index
    %3 = vector.load %arg8[%c0_3, %c0_4] : memref<1x32xf32, #tpu.memory_space<vmem>>, vector<1x32xf32>
    %c0_5 = arith.constant 0 : index
    %c0_6 = arith.constant 0 : index
    %4 = vector.load %arg4[%c0_5, %c0_6] : memref<32x32xf32, #tpu.memory_space<vmem>>, vector<32x32xf32>
    %cst_7 = arith.constant dense<0.000000e+00> : vector<16x32xf32>
    %5 = tpu.matmul %2, %4, %cst_7 {dimension_numbers = #tpu.dot_dimension_numbers<[1], [0], [0], [1], [0, 0, 1, 1], [], []>} : vector<16x32xf32>, vector<32x32xf32>, vector<16x32xf32> -> vector<16x32xf32>
    %6 = vector.broadcast %3 : vector<1x32xf32> to vector<16x32xf32>
    %7 = arith.mulf %5, %6 : vector<16x32xf32>
    %c0_8 = arith.constant 0 : index
    %c0_9 = arith.constant 0 : index
    %8 = vector.load %arg17[%c0_8, %c0_9] : memref<16x32xf32, #tpu.memory_space<vmem>>, vector<16x32xf32>
    tpu.vector_store %arg17[%c0_8, %c0_9], %7 {strides = array<i32>} : memref<16x32xf32, #tpu.memory_space<vmem>>, vector<16x32xf32>,
    %c0_10 = arith.constant 0 : index
    %c0_11 = arith.constant 0 : index
    %9 = vector.load %arg5[%c0_10, %c0_11] : memref<32x32xf32, #tpu.memory_space<vmem>>, vector<32x32xf32>
    %cst_12 = arith.constant dense<0.000000e+00> : vector<16x32xf32>
    %10 = tpu.matmul %2, %9, %cst_12 {dimension_numbers = #tpu.dot_dimension_numbers<[1], [0], [0], [1], [0, 0, 1, 1], [], []>} : vector<16x32xf32>, vector<32x32xf32>, vector<16x32xf32> -> vector<16x32xf32>
    %11 = vector.broadcast %3 : vector<1x32xf32> to vector<16x32xf32>
    %12 = arith.mulf %10, %11 : vector<16x32xf32>
    %c0_13 = arith.constant 0 : index
    %c0_14 = arith.constant 0 : index
    %13 = vector.load %arg18[%c0_13, %c0_14] : memref<16x32xf32, #tpu.memory_space<vmem>>, vector<16x32xf32>
    tpu.vector_store %arg18[%c0_13, %c0_14], %12 {strides = array<i32>} : memref<16x32xf32, #tpu.memory_space<vmem>>, vector<16x32xf32>,
    %c0_15 = arith.constant 0 : index
    %c0_16 = arith.constant 0 : index
    %14 = vector.load %arg6[%c0_15, %c0_16] : memref<1x32xf32, #tpu.memory_space<vmem>>, vector<1x32xf32>
    %c0_17 = arith.constant 0 : index
    %c0_18 = arith.constant 0 : index
    %15 = vector.load %arg7[%c0_17, %c0_18] : memref<1x32xf32, #tpu.memory_space<vmem>>, vector<1x32xf32>
    %c0_19 = arith.constant 0 : index
    %c0_20 = arith.constant 0 : index
    %16 = vector.load %arg17[%c0_19, %c0_20] : memref<16x32xf32, #tpu.memory_space<vmem>>, vector<15x32xf32>
    %c0_21 = arith.constant 0 : index
    %c0_22 = arith.constant 0 : index
    %17 = vector.load %arg18[%c0_21, %c0_22] : memref<16x32xf32, #tpu.memory_space<vmem>>, vector<15x32xf32>
    %c1 = arith.constant 1 : index
    %c0_23 = arith.constant 0 : index
    %18 = vector.load %arg17[%c1, %c0_23] : memref<16x32xf32, #tpu.memory_space<vmem>>, vector<15x32xf32>
    %c1_24 = arith.constant 1 : index
    %c0_25 = arith.constant 0 : index
    %19 = vector.load %arg18[%c1_24, %c0_25] : memref<16x32xf32, #tpu.memory_space<vmem>>, vector<15x32xf32>
    %c1_26 = arith.constant 1 : index
    %c0_27 = arith.constant 0 : index
    %20 = vector.load %arg2[%c1_26, %c0_27] : memref<16x32xi32, #tpu.memory_space<vmem>>, vector<15x32xi32>
    %c1_i32 = arith.constant 1 : i32
    %21 = vector.broadcast %c1_i32 : i32 to vector<15x32xi32>
    %22 = arith.cmpi sge, %20, %21 : vector<15x32xi32>
    %23 = vector.broadcast %14 : vector<1x32xf32> to vector<15x32xf32>
    %24 = arith.mulf %23, %16 : vector<15x32xf32>
    %25 = vector.broadcast %15 : vector<1x32xf32> to vector<15x32xf32>
    %26 = arith.mulf %25, %17 : vector<15x32xf32>
    %27 = arith.subf %24, %26 : vector<15x32xf32>
    %cst_28 = arith.constant 0.000000e+00 : f32
    %28 = vector.broadcast %cst_28 : f32 to vector<15x32xf32>
    %29 = arith.select %22, %27, %28 : vector<15x32xi1>, vector<15x32xf32>
    %30 = vector.broadcast %14 : vector<1x32xf32> to vector<15x32xf32>
    %31 = arith.mulf %30, %17 : vector<15x32xf32>
    %32 = vector.broadcast %15 : vector<1x32xf32> to vector<15x32xf32>
    %33 = arith.mulf %32, %16 : vector<15x32xf32>
    %34 = arith.addf %31, %33 : vector<15x32xf32>
    %cst_29 = arith.constant 0.000000e+00 : f32
    %35 = vector.broadcast %cst_29 : f32 to vector<15x32xf32>
    %36 = arith.select %22, %34, %35 : vector<15x32xi1>, vector<15x32xf32>
    %37 = arith.addf %18, %29 : vector<15x32xf32>
    %c1_30 = arith.constant 1 : index
    %c0_31 = arith.constant 0 : index
    %38 = vector.load %arg17[%c1_30, %c0_31] : memref<16x32xf32, #tpu.memory_space<vmem>>, vector<15x32xf32>
    tpu.vector_store %arg17[%c1_30, %c0_31], %37 {strides = array<i32>} : memref<16x32xf32, #tpu.memory_space<vmem>>, vector<15x32xf32>,
    %39 = arith.addf %19, %36 : vector<15x32xf32>
    %c1_32 = arith.constant 1 : index
    %c0_33 = arith.constant 0 : index
    %40 = vector.load %arg18[%c1_32, %c0_33] : memref<16x32xf32, #tpu.memory_space<vmem>>, vector<15x32xf32>
    tpu.vector_store %arg18[%c1_32, %c0_33], %39 {strides = array<i32>} : memref<16x32xf32, #tpu.memory_space<vmem>>, vector<15x32xf32>,
    %41 = arith.mulf %14, %14 : vector<1x32xf32>
    %42 = arith.mulf %15, %15 : vector<1x32xf32>
    %43 = arith.subf %41, %42 : vector<1x32xf32>
    %cst_34 = arith.constant 2.000000e+00 : f32
    %44 = vector.broadcast %cst_34 : f32 to vector<1x32xf32>
    %45 = arith.mulf %44, %14 : vector<1x32xf32>
    %46 = arith.mulf %45, %15 : vector<1x32xf32>
    %c0_35 = arith.constant 0 : index
    %c0_36 = arith.constant 0 : index
    %47 = vector.load %arg17[%c0_35, %c0_36] : memref<16x32xf32, #tpu.memory_space<vmem>>, vector<14x32xf32>
    %c0_37 = arith.constant 0 : index
    %c0_38 = arith.constant 0 : index
    %48 = vector.load %arg18[%c0_37, %c0_38] : memref<16x32xf32, #tpu.memory_space<vmem>>, vector<14x32xf32>
    %c2 = arith.constant 2 : index
    %c0_39 = arith.constant 0 : index
    %49 = vector.load %arg17[%c2, %c0_39] : memref<16x32xf32, #tpu.memory_space<vmem>>, vector<14x32xf32>
    %c2_40 = arith.constant 2 : index
    %c0_41 = arith.constant 0 : index
    %50 = vector.load %arg18[%c2_40, %c0_41] : memref<16x32xf32, #tpu.memory_space<vmem>>, vector<14x32xf32>
    %c2_42 = arith.constant 2 : index
    %c0_43 = arith.constant 0 : index
    %51 = vector.load %arg2[%c2_42, %c0_43] : memref<16x32xi32, #tpu.memory_space<vmem>>, vector<14x32xi32>
    %c2_i32 = arith.constant 2 : i32
    %52 = vector.broadcast %c2_i32 : i32 to vector<14x32xi32>
    %53 = arith.cmpi sge, %51, %52 : vector<14x32xi32>
    %54 = vector.broadcast %43 : vector<1x32xf32> to vector<14x32xf32>
    %55 = arith.mulf %54, %47 : vector<14x32xf32>
    %56 = vector.broadcast %46 : vector<1x32xf32> to vector<14x32xf32>
    %57 = arith.mulf %56, %48 : vector<14x32xf32>
    %58 = arith.subf %55, %57 : vector<14x32xf32>
    %cst_44 = arith.constant 0.000000e+00 : f32
    %59 = vector.broadcast %cst_44 : f32 to vector<14x32xf32>
    %60 = arith.select %53, %58, %59 : vector<14x32xi1>, vector<14x32xf32>
    %61 = vector.broadcast %43 : vector<1x32xf32> to vector<14x32xf32>
    %62 = arith.mulf %61, %48 : vector<14x32xf32>
    %63 = vector.broadcast %46 : vector<1x32xf32> to vector<14x32xf32>
    %64 = arith.mulf %63, %47 : vector<14x32xf32>
    %65 = arith.addf %62, %64 : vector<14x32xf32>
    %cst_45 = arith.constant 0.000000e+00 : f32
    %66 = vector.broadcast %cst_45 : f32 to vector<14x32xf32>
    %67 = arith.select %53, %65, %66 : vector<14x32xi1>, vector<14x32xf32>
    %68 = arith.addf %49, %60 : vector<14x32xf32>
    %c2_46 = arith.constant 2 : index
    %c0_47 = arith.constant 0 : index
    %69 = vector.load %arg17[%c2_46, %c0_47] : memref<16x32xf32, #tpu.memory_space<vmem>>, vector<14x32xf32>
    tpu.vector_store %arg17[%c2_46, %c0_47], %68 {strides = array<i32>} : memref<16x32xf32, #tpu.memory_space<vmem>>, vector<14x32xf32>,
    %70 = arith.addf %50, %67 : vector<14x32xf32>
    %c2_48 = arith.constant 2 : index
    %c0_49 = arith.constant 0 : index
    %71 = vector.load %arg18[%c2_48, %c0_49] : memref<16x32xf32, #tpu.memory_space<vmem>>, vector<14x32xf32>
    tpu.vector_store %arg18[%c2_48, %c0_49], %70 {strides = array<i32>} : memref<16x32xf32, #tpu.memory_space<vmem>>, vector<14x32xf32>,
    %72 = arith.mulf %43, %43 : vector<1x32xf32>
    %73 = arith.mulf %46, %46 : vector<1x32xf32>
    %74 = arith.subf %72, %73 : vector<1x32xf32>
    %cst_50 = arith.constant 2.000000e+00 : f32
    %75 = vector.broadcast %cst_50 : f32 to vector<1x32xf32>
    %76 = arith.mulf %75, %43 : vector<1x32xf32>
    %77 = arith.mulf %76, %46 : vector<1x32xf32>
    %c0_51 = arith.constant 0 : index
    %c0_52 = arith.constant 0 : index
    %78 = vector.load %arg17[%c0_51, %c0_52] : memref<16x32xf32, #tpu.memory_space<vmem>>, vector<12x32xf32>
    %c0_53 = arith.constant 0 : index
    %c0_54 = arith.constant 0 : index
    %79 = vector.load %arg18[%c0_53, %c0_54] : memref<16x32xf32, #tpu.memory_space<vmem>>, vector<12x32xf32>
    %c4 = arith.constant 4 : index
    %c0_55 = arith.constant 0 : index
    %80 = vector.load %arg17[%c4, %c0_55] : memref<16x32xf32, #tpu.memory_space<vmem>>, vector<12x32xf32>
    %c4_56 = arith.constant 4 : index
    %c0_57 = arith.constant 0 : index
    %81 = vector.load %arg18[%c4_56, %c0_57] : memref<16x32xf32, #tpu.memory_space<vmem>>, vector<12x32xf32>
    %c4_58 = arith.constant 4 : index
    %c0_59 = arith.constant 0 : index
    %82 = vector.load %arg2[%c4_58, %c0_59] : memref<16x32xi32, #tpu.memory_space<vmem>>, vector<12x32xi32>
    %c4_i32 = arith.constant 4 : i32
    %83 = vector.broadcast %c4_i32 : i32 to vector<12x32xi32>
    %84 = arith.cmpi sge, %82, %83 : vector<12x32xi32>
    %85 = vector.broadcast %74 : vector<1x32xf32> to vector<12x32xf32>
    %86 = arith.mulf %85, %78 : vector<12x32xf32>
    %87 = vector.broadcast %77 : vector<1x32xf32> to vector<12x32xf32>
    %88 = arith.mulf %87, %79 : vector<12x32xf32>
    %89 = arith.subf %86, %88 : vector<12x32xf32>
    %cst_60 = arith.constant 0.000000e+00 : f32
    %90 = vector.broadcast %cst_60 : f32 to vector<12x32xf32>
    %91 = arith.select %84, %89, %90 : vector<12x32xi1>, vector<12x32xf32>
    %92 = vector.broadcast %74 : vector<1x32xf32> to vector<12x32xf32>
    %93 = arith.mulf %92, %79 : vector<12x32xf32>
    %94 = vector.broadcast %77 : vector<1x32xf32> to vector<12x32xf32>
    %95 = arith.mulf %94, %78 : vector<12x32xf32>
    %96 = arith.addf %93, %95 : vector<12x32xf32>
    %cst_61 = arith.constant 0.000000e+00 : f32
    %97 = vector.broadcast %cst_61 : f32 to vector<12x32xf32>
    %98 = arith.select %84, %96, %97 : vector<12x32xi1>, vector<12x32xf32>
    %99 = arith.addf %80, %91 : vector<12x32xf32>
    %c4_62 = arith.constant 4 : index
    %c0_63 = arith.constant 0 : index
    %100 = vector.load %arg17[%c4_62, %c0_63] : memref<16x32xf32, #tpu.memory_space<vmem>>, vector<12x32xf32>
    tpu.vector_store %arg17[%c4_62, %c0_63], %99 {strides = array<i32>} : memref<16x32xf32, #tpu.memory_space<vmem>>, vector<12x32xf32>,
    %101 = arith.addf %81, %98 : vector<12x32xf32>
    %c4_64 = arith.constant 4 : index
    %c0_65 = arith.constant 0 : index
    %102 = vector.load %arg18[%c4_64, %c0_65] : memref<16x32xf32, #tpu.memory_space<vmem>>, vector<12x32xf32>
    tpu.vector_store %arg18[%c4_64, %c0_65], %101 {strides = array<i32>} : memref<16x32xf32, #tpu.memory_space<vmem>>, vector<12x32xf32>,
    %c0_66 = arith.constant 0 : index
    %c0_67 = arith.constant 0 : index
    %103 = vector.load %arg17[%c0_66, %c0_67] : memref<16x32xf32, #tpu.memory_space<vmem>>, vector<16x32xf32>
    %c0_68 = arith.constant 0 : index
    %c0_69 = arith.constant 0 : index
    %104 = vector.load %arg18[%c0_68, %c0_69] : memref<16x32xf32, #tpu.memory_space<vmem>>, vector<16x32xf32>
    %c0_70 = arith.constant 0 : index
    %c0_71 = arith.constant 0 : index
    %105 = vector.load %arg9[%c0_70, %c0_71] : memref<32x32xf32, #tpu.memory_space<vmem>>, vector<32x32xf32>
    %cst_72 = arith.constant dense<0.000000e+00> : vector<16x32xf32>
    %106 = tpu.matmul %103, %105, %cst_72 {dimension_numbers = #tpu.dot_dimension_numbers<[1], [0], [0], [1], [0, 0, 1, 1], [], []>} : vector<16x32xf32>, vector<32x32xf32>, vector<16x32xf32> -> vector<16x32xf32>
    %c0_73 = arith.constant 0 : index
    %c0_74 = arith.constant 0 : index
    %107 = vector.load %arg10[%c0_73, %c0_74] : memref<32x32xf32, #tpu.memory_space<vmem>>, vector<32x32xf32>
    %cst_75 = arith.constant dense<0.000000e+00> : vector<16x32xf32>
    %108 = tpu.matmul %104, %107, %cst_75 {dimension_numbers = #tpu.dot_dimension_numbers<[1], [0], [0], [1], [0, 0, 1, 1], [], []>} : vector<16x32xf32>, vector<32x32xf32>, vector<16x32xf32> -> vector<16x32xf32>
    %109 = arith.subf %106, %108 : vector<16x32xf32>
    %cst_76 = arith.constant 2.000000e+00 : f32
    %110 = vector.broadcast %cst_76 : f32 to vector<16x32xf32>
    %111 = arith.mulf %110, %109 : vector<16x32xf32>
    %c0_77 = arith.constant 0 : index
    %c0_78 = arith.constant 0 : index
    %112 = vector.load %arg11[%c0_77, %c0_78] : memref<32x32xf32, #tpu.memory_space<vmem>>, vector<32x32xf32>
    %cst_79 = arith.constant dense<0.000000e+00> : vector<16x32xf32>
    %113 = tpu.matmul %2, %112, %cst_79 {dimension_numbers = #tpu.dot_dimension_numbers<[1], [0], [0], [1], [0, 0, 1, 1], [], []>} : vector<16x32xf32>, vector<32x32xf32>, vector<16x32xf32> -> vector<16x32xf32>
    %114 = arith.addf %111, %113 : vector<16x32xf32>
    %c0_80 = arith.constant 0 : index
    %c0_81 = arith.constant 0 : index
    %115 = vector.load %arg12[%c0_80, %c0_81] : memref<32x30xf32, #tpu.memory_space<vmem>>, vector<32x30xf32>
    %cst_82 = arith.constant dense<0.000000e+00> : vector<16x30xf32>
    %116 = tpu.matmul %114, %115, %cst_82 {dimension_numbers = #tpu.dot_dimension_numbers<[1], [0], [0], [1], [0, 0, 1, 1], [], []>} : vector<16x32xf32>, vector<32x30xf32>, vector<16x30xf32> -> vector<16x30xf32>
    %cst_83 = arith.constant 0.000000e+00 : f32
    %117 = vector.broadcast %cst_83 : f32 to vector<16x30xf32>
    %118 = arith.subf %117, %116 : vector<16x30xf32>
    %119 = math.exp %118 : vector<16x30xf32>
    %cst_84 = arith.constant 1.000000e+00 : f32
    %120 = vector.broadcast %cst_84 : f32 to vector<16x30xf32>
    %121 = arith.addf %120, %119 : vector<16x30xf32>
    %cst_85 = arith.constant 1.000000e+00 : f32
    %122 = vector.broadcast %cst_85 : f32 to vector<16x30xf32>
    %123 = arith.divf %122, %121 : vector<16x30xf32>
    %124 = arith.mulf %116, %123 : vector<16x30xf32>
    %c0_86 = arith.constant 0 : index
    %c0_87 = arith.constant 0 : index
    %125 = vector.load %arg13[%c0_86, %c0_87] : memref<30x30xf32, #tpu.memory_space<vmem>>, vector<30x30xf32>
    %cst_88 = arith.constant dense<0.000000e+00> : vector<16x30xf32>
    %126 = tpu.matmul %124, %125, %cst_88 {dimension_numbers = #tpu.dot_dimension_numbers<[1], [0], [0], [1], [0, 0, 1, 1], [], []>} : vector<16x30xf32>, vector<30x30xf32>, vector<16x30xf32> -> vector<16x30xf32>
    %cst_89 = arith.constant 0.000000e+00 : f32
    %127 = vector.broadcast %cst_89 : f32 to vector<16x30xf32>
    %128 = arith.maximumf %126, %127 : vector<16x30xf32>
    %c0_90 = arith.constant 0 : index
    %c0_91 = arith.constant 0 : index
    %129 = vector.load %arg14[%c0_90, %c0_91] : memref<30x32xf32, #tpu.memory_space<vmem>>, vector<30x32xf32>
    %cst_92 = arith.constant dense<0.000000e+00> : vector<16x32xf32>
    %130 = tpu.matmul %128, %129, %cst_92 {dimension_numbers = #tpu.dot_dimension_numbers<[1], [0], [0], [1], [0, 0, 1, 1], [], []>} : vector<16x30xf32>, vector<30x32xf32>, vector<16x32xf32> -> vector<16x32xf32>
    %c0_93 = arith.constant 0 : index
    %c0_94 = arith.constant 0 : index
    %131 = vector.load %arg15[%c0_93, %c0_94] : memref<32x32xf32, #tpu.memory_space<vmem>>, vector<32x32xf32>
    %cst_95 = arith.constant dense<0.000000e+00> : vector<16x32xf32>
    %132 = tpu.matmul %2, %131, %cst_95 {dimension_numbers = #tpu.dot_dimension_numbers<[1], [0], [0], [1], [0, 0, 1, 1], [], []>} : vector<16x32xf32>, vector<32x32xf32>, vector<16x32xf32> -> vector<16x32xf32>
    %133 = arith.addf %130, %132 : vector<16x32xf32>
    %c0_96 = arith.constant 0 : index
    %c0_97 = arith.constant 0 : index
    %134 = vector.load %arg16[%c0_96, %c0_97] : memref<16x32xf32, #tpu.memory_space<vmem>>, vector<16x32xf32>
    tpu.vector_store %arg16[%c0_96, %c0_97], %133 {strides = array<i32>} : memref<16x32xf32, #tpu.memory_space<vmem>>, vector<16x32xf32>,
    return
  }
  func.func @transform_0(%arg0: i32) -> (i32, i32) {
    %c0_i32 = arith.constant 0 : i32
    %c0_i32_0 = arith.constant 0 : i32
    return %arg0, %c0_i32 : i32, i32
  }
  func.func @transform_1(%arg0: i32) -> (i32, i32) {
    %c0_i32 = arith.constant 0 : i32
    %c0_i32_0 = arith.constant 0 : i32
    %c0_i32_1 = arith.constant 0 : i32
    return %c0_i32, %c0_i32_0 : i32, i32
  }
  func.func @transform_2(%arg0: i32) -> (i32, i32) {
    %c0_i32 = arith.constant 0 : i32
    %c0_i32_0 = arith.constant 0 : i32
    %c0_i32_1 = arith.constant 0 : i32
    return %c0_i32, %c0_i32_0 : i32, i32
  }
  func.func @transform_3(%arg0: i32) -> (i32, i32) {
    %c0_i32 = arith.constant 0 : i32
    %c0_i32_0 = arith.constant 0 : i32
    %c0_i32_1 = arith.constant 0 : i32
    return %c0_i32, %c0_i32_0 : i32, i32
  }
  func.func @transform_4(%arg0: i32) -> (i32, i32) {
    %c0_i32 = arith.constant 0 : i32
    %c0_i32_0 = arith.constant 0 : i32
    %c0_i32_1 = arith.constant 0 : i32
    return %c0_i32, %c0_i32_0 : i32, i32
  }
  func.func @transform_5(%arg0: i32) -> (i32, i32) {
    %c0_i32 = arith.constant 0 : i32
    %c0_i32_0 = arith.constant 0 : i32
    %c0_i32_1 = arith.constant 0 : i32
    return %c0_i32, %c0_i32_0 : i32, i32
  }
  func.func @transform_6(%arg0: i32) -> (i32, i32) {
    %c0_i32 = arith.constant 0 : i32
    %c0_i32_0 = arith.constant 0 : i32
    %c0_i32_1 = arith.constant 0 : i32
    return %c0_i32, %c0_i32_0 : i32, i32
  }
  func.func @transform_7(%arg0: i32) -> (i32, i32) {
    %c0_i32 = arith.constant 0 : i32
    %c0_i32_0 = arith.constant 0 : i32
    %c0_i32_1 = arith.constant 0 : i32
    return %c0_i32, %c0_i32_0 : i32, i32
  }
  func.func @transform_8(%arg0: i32) -> (i32, i32) {
    %c0_i32 = arith.constant 0 : i32
    %c0_i32_0 = arith.constant 0 : i32
    %c0_i32_1 = arith.constant 0 : i32
    return %c0_i32, %c0_i32_0 : i32, i32
  }
  func.func @transform_9(%arg0: i32) -> (i32, i32) {
    %c0_i32 = arith.constant 0 : i32
    %c0_i32_0 = arith.constant 0 : i32
    %c0_i32_1 = arith.constant 0 : i32
    return %c0_i32, %c0_i32_0 : i32, i32
  }
  func.func @transform_10(%arg0: i32) -> (i32, i32) {
    %c0_i32 = arith.constant 0 : i32
    %c0_i32_0 = arith.constant 0 : i32
    %c0_i32_1 = arith.constant 0 : i32
    return %c0_i32, %c0_i32_0 : i32, i32
  }
  func.func @transform_11(%arg0: i32) -> (i32, i32) {
    %c0_i32 = arith.constant 0 : i32
    %c0_i32_0 = arith.constant 0 : i32
    %c0_i32_1 = arith.constant 0 : i32
    return %c0_i32, %c0_i32_0 : i32, i32
  }
  func.func @transform_12(%arg0: i32) -> (i32, i32) {
    %c0_i32 = arith.constant 0 : i32
    %c0_i32_0 = arith.constant 0 : i32
    %c0_i32_1 = arith.constant 0 : i32
    return %c0_i32, %c0_i32_0 : i32, i32
  }
  func.func @transform_13(%arg0: i32) -> (i32, i32) {
    %c0_i32 = arith.constant 0 : i32
    %c0_i32_0 = arith.constant 0 : i32
    %c0_i32_1 = arith.constant 0 : i32
    return %c0_i32, %c0_i32_0 : i32, i32
  }
  func.func @transform_14(%arg0: i32) -> (i32, i32) {
    %c0_i32 = arith.constant 0 : i32
    %c0_i32_0 = arith.constant 0 : i32
    %c0_i32_1 = arith.constant 0 : i32
    return %c0_i32, %c0_i32_0 : i32, i32
  }
  func.func @transform_15(%arg0: i32) -> (i32, i32) {
    %c0_i32 = arith.constant 0 : i32
    %c0_i32_0 = arith.constant 0 : i32
    return %arg0, %c0_i32 : i32, i32
  }
}

</mosaic_0001>

<bundles_post_ra>
// kernel: deep_lru_forward.3
= control target key start
LH: loop header
LB: loop body
LE: loop exit
PB: predicated region body
PF: predicated region fallthrough
CT: control target
= control target key end

     0   :  { %vm57_vm0 = vcmask 261120   ;;  %v247_v29 = vlaneseq  ;;  %vm277_vm3 = vcmask 260096   ;;  %vm331_vm6 = vcmask 259072   ;;  %s1702_s2 = inlined_call_operand.vmem [shape: f32[32,32], index: 2, kind: input, shape index: {}]   ;;  %s1703_s3 = inlined_call_operand.vmem [shape: f32[32,32], index: 3, kind: input, shape index: {}]   ;;  %s1704_s0 = inlined_call_operand.vmem [shape: f32[16,32], index: 0, kind: input, shape index: {}]   ;;  %s1705_s7 = inlined_call_operand.vmem [shape: f32[32,32], index: 7, kind: input, shape index: {}]   ;;  %s1706_s8 = inlined_call_operand.vmem [shape: f32[32,32], index: 8, kind: input, shape index: {}]   ;;  %s1707_s9 = inlined_call_operand.vmem [shape: f32[32,32], index: 9, kind: input, shape index: {}]   ;;  %s1708_s6 = inlined_call_operand.vmem [shape: f32[1,32], index: 6, kind: input, shape index: {}]   ;;  %s1709_s4 = inlined_call_operand.vmem [shape: f32[1,32], index: 4, kind: input, shape index: {}]   ;;  %s1710_s5 = inlined_call_operand.vmem [shape: f32[1,32], index: 5, kind: input, shape index: {}]   ;;  %s1711_s1 = inlined_call_operand.vmem [shape: s32[16,32], index: 1, kind: input, shape index: {}]   ;;  %s1712_s10 = inlined_call_operand.vmem [shape: f32[32,30], index: 10, kind: input, shape index: {}]   ;;  %s1713_s11 = inlined_call_operand.vmem [shape: f32[30,30], index: 11, kind: input, shape index: {}]   ;;  %s1714_s13 = inlined_call_operand.vmem [shape: f32[32,32], index: 13, kind: input, shape index: {}]   ;;  %s1715_s12 = inlined_call_operand.vmem [shape: f32[30,32], index: 12, kind: input, shape index: {}]   ;;  %s1716_s14 = inlined_call_operand.vmem [shape: f32[32,4], index: 14, kind: input, shape index: {}]   ;;  %s1717_s15 = inlined_call_operand.vmem [shape: f32[16,4], index: 15, kind: output, shape index: {}]  }
   0x1   :  { %v53_v0 = vld [vmem:[%s1702_s2] sm:$0xff]  ;;  %v54_v1 = vld [vmem:[%s1702_s2 + $0x8] sm:$0xff]  ;;  %v55_v5 = vld [vmem:[%s1702_s2 + $0x10] sm:$0xff]  ;;  %vm385_vm9 = vcmask 257024   ;;  %vm760_vm10 = vcmask 1045504   ;;  %vm1388_vm11 = vmmov 1  }
   0x2   :  { %v149_v2 = vld [vmem:[%s1703_s3] sm:$0xff]  ;;  %v1293_v3 = vpack.c.bf16 %v54_v1, %v53_v0  ;;  %v150_v4 = vld [vmem:[%s1703_s3 + $0x8] sm:$0xff]  ;;  %v56_v6 = vld [vmem:[%s1702_s2 + $0x18] sm:$0xff]  ;;  %v248_v31 = vshrl.u32 %v247_v29, 7  ;;  %vm753_vm13 = vcmask 244736   ;;  %vm1093_vm14 = vcmask 31744  }
   0x3   :  { %v1301_v7 = vpack.c.bf16 %v150_v4, %v149_v2  ;;  %v1297_v8 = vpack.c.bf16 %v56_v6, %v55_v5  ;;  %v151_v9 = vld [vmem:[%s1703_s3 + $0x10] sm:$0xff]  ;;  %v152_v10 = vld [vmem:[%s1703_s3 + $0x18] sm:$0xff]  ;;  %v1496_v11 = vld [vmem:[%s1704_s0] sm:$0xff] }
   0x4   :  { %1294 = vmatprep.subr.bf16.mxu0 %v1293_v3  ;;  %v1305_v12 = vpack.c.bf16 %v152_v10, %v151_v9  ;;  %1191 = vmatprep.mubr.msk.f32.mxu0 %vm57_vm0, %v1496_v11  ;;  %v1505_v13 = vld [vmem:[%s1704_s0 + $0x8] sm:$0xff]  ;;  %v395_v14 = vld [vmem:[%s1705_s7] sm:$0xff]  ;;  %v397_v19 = vld [vmem:[%s1705_s7 + $0x10] sm:$0xff]  ;;  %v1548_v39 = vsub.s32 0, %v248_v31 }
   0x5   :  { %1302 = vmatprep.subr.bf16.mxu1 %v1301_v7  ;;  %1296 = vmatpush3.bf16.msra.mxu0 %v1293_v3  ;;  %v396_v15 = vld [vmem:[%s1705_s7 + $0x8] sm:$0xff]  ;;  %v480_v16 = vld [vmem:[%s1706_s8] sm:$0xff]  ;;  %v398_v20 = vld [vmem:[%s1705_s7 + $0x18] sm:$0xff] }
   0x6   :  { %1304 = vmatpush3.bf16.msra.mxu1 %v1301_v7  ;;  %1298 = vmatprep.subr.bf16.mxu0 %v1297_v8  ;;  %v1309_v17 = vpack.c.bf16 %v396_v15, %v395_v14  ;;  %v481_v18 = vld [vmem:[%s1706_s8 + $0x8] sm:$0xff]  ;;  %v1313_v22 = vpack.c.bf16 %v398_v20, %v397_v19  ;;  %v482_v23 = vld [vmem:[%s1706_s8 + $0x10] sm:$0xff]  ;;  %v483_v24 = vld [vmem:[%s1706_s8 + $0x18] sm:$0xff] }
   0x7   :  { %1306 = vmatprep.subr.bf16.mxu1 %v1305_v12  ;;  %1202 = vmatprep.mubr.msk.f32.mxu1 %vm57_vm0, %v1496_v11  ;;  %v1317_v21 = vpack.c.bf16 %v481_v18, %v480_v16  ;;  %v1321_v25 = vpack.c.bf16 %v483_v24, %v482_v23  ;;  %v569_v26 = vld [vmem:[%s1707_s9] sm:$0xff]  ;;  %v570_v27 = vld [vmem:[%s1707_s9 + $0x8] sm:$0xff]  ;;  %vm1640_vm12 = vmpackc.low %vm760_vm10, %vm1388_vm11 }
   0x8   :  { %v1541_v28 = vpack.c.bf16 %v570_v27, %v569_v26  ;;  %v1102_v30 = vld [vmem:[%s1708_s6] ss:$0 sm:$0xff]  ;;  %v243_v46 = vld [vmem:[%s1711_s1 + $0x9] sm:$0x7f]  ;;  %v242_v51 = vld [vmem:[%s1711_s1 + $0x1] sm:$0xff] }
   0x9   :  { %1300 = vmatpush3.bf16.msra.mxu0 %v1297_v8  ;;  %v232_v41 = vld [vmem:[%s1709_s4] sm:$0x1]  ;;  %vm245_vm1 = vcmp.ge.s32.totalorder %v243_v46, 1  ;;  %vm244_vm2 = vcmp.ge.s32.totalorder %v242_v51, 1  ;;  %v296_v18 = vld [vmem:[%s1711_s1 + $0x2] sm:$0xff] }
   0xa   :  { %1308 = vmatpush3.bf16.msra.mxu1 %v1305_v12  ;;  %1310 = vmatprep.subr.bf16.mxu0 %v1309_v17  ;;  %v233_v42 = vld [vmem:[%s1710_s5] sm:$0x1]  ;;  %v250_v43 = vrot.slane %v232_v41, %v1548_v39  ;;  %v286_v61 = vmul.f32 2.0, %v232_v41  ;;  %v283_v4 = vmul.f32 %v232_v41, %v232_v41  ;;  %vm298_vm4 = vcmp.ge.s32.totalorder %v296_v18, 2 }
   0xb   :  { %1318 = vmatprep.subr.bf16.mxu1 %v1317_v21  ;;  %v258_v44 = vrot.slane %v233_v42, %v1548_v39  ;;  %v284_v5 = vmul.f32 %v233_v42, %v233_v42 }
   0xc   :  { %1192 = vmatmul.mubr.msk.f32.vlgmr.msra.gmra.mrb[0].mxu0 %vm57_vm0, %v1505_v13 }
   0xd   :  { %1203 = vmatmul.mubr.msk.f32.vlgmr.msra.gmra.mrb[0].mxu1 %vm57_vm0, %v1505_v13  ;;  %1312 = vmatpush3.bf16.msra.mxu0 %v1309_v17  ;;  %v285_v16 = vsub.f32 %v283_v4, %v284_v5  ;;  %v287_v17 = vmul.f32 %v286_v61, %v233_v42  ;;  %v351_v61 = vld [vmem:[%s1711_s1 + $0xc] sm:$0xf] }
   0xe   :  { %1320 = vmatpush3.bf16.msra.mxu1 %v1317_v21  ;;  %1314 = vmatprep.subr.bf16.mxu0 %v1313_v22  ;;  %v297_v21 = vld [vmem:[%s1711_s1 + $0xa] sm:$0x3f]  ;;  %vm353_vm8 = vcmp.ge.s32.totalorder %v351_v61, 4 }
   0xf   :  { %1322 = vmatprep.subr.bf16.mxu1 %v1321_v25  ;;  %v304_v19 = vrot.slane %v285_v16, %v1548_v39  ;;  %v312_v20 = vrot.slane %v287_v17, %v1548_v39  ;;  %vm299_vm5 = vcmp.ge.s32.totalorder %v297_v21, 2 }
  0x11   :  { %1316 = vmatpush3.bf16.msra.mxu0 %v1313_v22 }
  0x12   :  { %1324 = vmatpush3.bf16.msra.mxu1 %v1321_v25  ;;  %1326 = vmatprep.subr.bf16.mxu0 %v1541_v28 }
  0xdf   :  { %v1193_v32 = vpop.f32.mrb[0].mxu0 }
  0xe0   :  { %v146_v33 = vmul.f32 %v1193_v32, %v1102_v30  ;;  %v1204_v34 = vpop.f32.mrb[0].mxu1  ;;  %v130_v35 = vpop.f32.mrb[1].mxu0 }
  0xe1   :  { %v229_v36 = vmul.f32 %v1204_v34, %v1102_v30  ;;  %v145_v37 = vmul.f32 %v1102_v30, %v130_v35  ;;  %v219_v38 = vpop.f32.mrb[1].mxu1  ;;  %v337_v35 = vmul.f32 %v285_v16, %v285_v16 }
  0xe2   :  { %148 = vst.msk [vmem:[#allocation2 + $0x8] sm:$0xff] %vm57_vm0, %v146_v33  ;;  %v228_v40 = vmul.f32 %v1102_v30, %v219_v38  ;;  %v340_v38 = vmul.f32 2.0, %v285_v16 }
  0xe3   :  { %231 = vst.msk [vmem:[#allocation3 + $0x8] sm:$0xff] %vm57_vm0, %v229_v36  ;;  %147 = vst.msk [vmem:[#allocation2] sm:$0xff] %vm57_vm0, %v145_v37  ;;  %v338_v36 = vmul.f32 %v287_v17, %v287_v17 }
  0xe4   :  { %230 = vst.msk [vmem:[#allocation3] sm:$0xff] %vm57_vm0, %v228_v40 }
  0xe9   :  { %v235_v45 = vld [vmem:[#allocation2 + $0x8] sm:$0x7f] }
  0xea   :  { %v237_v47 = vld [vmem:[#allocation3 + $0x8] sm:$0x7f]  ;;  %v253_v48 = vmul.f32 %v250_v43, %v235_v45  ;;  %v269_v49 = vmul.f32 %v258_v44, %v235_v45  ;;  %v234_v50 = vld [vmem:[#allocation2] sm:$0xff]  ;;  %v239_v0 = vld [vmem:[#allocation2 + $0x9] sm:$0x7f] }
  0xeb   :  { %v261_v52 = vmul.f32 %v258_v44, %v237_v47  ;;  %v267_v53 = vmul.f32 %v250_v43, %v237_v47  ;;  %v236_v54 = vld [vmem:[#allocation3] sm:$0xff]  ;;  %v252_v55 = vmul.f32 %v250_v43, %v234_v50  ;;  %v268_v56 = vmul.f32 %v258_v44, %v234_v50  ;;  %v241_v1 = vld [vmem:[#allocation3 + $0x9] sm:$0x7f]  ;;  %v238_v8 = vld [vmem:[#allocation2 + $0x1] sm:$0xff] }
  0xec   :  { %v260_v57 = vmul.f32 %v258_v44, %v236_v54  ;;  %v266_v58 = vmul.f32 %v250_v43, %v236_v54  ;;  %v240_v9 = vld [vmem:[#allocation3 + $0x1] sm:$0xff] }
  0xed   :  { %v263_v59 = vsub.f32 %v253_v48, %v261_v52  ;;  %v271_v60 = vadd.f32 %v269_v49, %v267_v53 }
  0xee   :  { %v262_v62 = vsub.f32 %v252_v55, %v260_v57  ;;  %v270_v63 = vadd.f32 %v268_v56, %v266_v58  ;;  %v339_v55 = vsub.f32 %v337_v35, %v338_v36  ;;  %v341_v56 = vmul.f32 %v340_v38, %v287_v17  ;;  %v651_v35 = vld [vmem:[%s1712_s10 + $0x8] sm:$0xff] }
  0xef   :  { %v265_v2 = vsel %vm245_vm1, %v263_v59, 0.0  ;;  %v273_v3 = vsel %vm245_vm1, %v271_v60, 0.0  ;;  %v350_v59 = vld [vmem:[%s1711_s1 + $0x4] sm:$0xff] }
  0xf0   :  { %v275_v6 = vadd.f32 %v265_v2, %v239_v0  ;;  %v280_v7 = vadd.f32 %v273_v3, %v241_v1  ;;  %v264_v10 = vsel %vm244_vm2, %v262_v62, 0.0  ;;  %v272_v12 = vsel %vm244_vm2, %v270_v63, 0.0 }
  0xf1   :  { %v274_v14 = vadd.f32 %v264_v10, %v238_v8  ;;  %v279_v15 = vadd.f32 %v272_v12, %v240_v9  ;;  %v358_v57 = vrot.slane %v339_v55, %v1548_v39  ;;  %v366_v58 = vrot.slane %v341_v56, %v1548_v39  ;;  %v751_v55 = vld [vmem:[%s1713_s11 + $0x10] sm:$0xff]  ;;  %v752_v56 = vld [vmem:[%s1713_s11 + $0x18] sm:$0x3f] }
  0xf2   :  { %278 = vst.msk [vmem:[#allocation2 + $0x9] sm:$0x7f] %vm277_vm3, %v275_v6  ;;  %282 = vst.msk [vmem:[#allocation3 + $0x9] sm:$0x7f] %vm277_vm3, %v280_v7  ;;  %vm352_vm7 = vcmp.ge.s32.totalorder %v350_v59, 4  ;;  %v846_v59 = vld [vmem:[%s1714_s13 + $0x8] sm:$0xff] }
  0xf3   :  { %276 = vst.msk [vmem:[#allocation2 + $0x1] sm:$0xff] %vm57_vm0, %v274_v14  ;;  %281 = vst.msk [vmem:[#allocation3 + $0x1] sm:$0xff] %vm57_vm0, %v279_v15 }
  0xf9   :  { %v293_v43 = vld [vmem:[#allocation2 + $0xa] sm:$0x3f]  ;;  %v295_v46 = vld [vmem:[#allocation3 + $0xa] sm:$0x3f] }
  0xfa   :  { %v288_v22 = vld [vmem:[#allocation2] sm:$0xff]  ;;  %v289_v23 = vld [vmem:[#allocation2 + $0x8] sm:$0x3f]  ;;  %v290_v24 = vld [vmem:[#allocation3] sm:$0xff] }
  0xfb   :  { %v291_v25 = vld [vmem:[#allocation3 + $0x8] sm:$0x3f]  ;;  %v306_v26 = vmul.f32 %v304_v19, %v288_v22  ;;  %v307_v27 = vmul.f32 %v304_v19, %v289_v23  ;;  %v314_v29 = vmul.f32 %v312_v20, %v290_v24  ;;  %v320_v30 = vmul.f32 %v304_v19, %v290_v24  ;;  %v292_v44 = vld [vmem:[#allocation2 + $0x2] sm:$0xff] }
  0xfc   :  { %v315_v31 = vmul.f32 %v312_v20, %v291_v25  ;;  %v321_v32 = vmul.f32 %v304_v19, %v291_v25  ;;  %v322_v33 = vmul.f32 %v312_v20, %v288_v22  ;;  %v323_v34 = vmul.f32 %v312_v20, %v289_v23  ;;  %v294_v47 = vld [vmem:[#allocation3 + $0x2] sm:$0xff] }
  0xfd   :  { %v316_v37 = vsub.f32 %v306_v26, %v314_v29  ;;  %v571_v26 = vld [vmem:[%s1707_s9 + $0x10] sm:$0xff] }
  0xfe   :  { %v317_v40 = vsub.f32 %v307_v27, %v315_v31  ;;  %v324_v41 = vadd.f32 %v322_v33, %v320_v30  ;;  %v325_v42 = vadd.f32 %v323_v34, %v321_v32  ;;  %v572_v27 = vld [vmem:[%s1707_s9 + $0x18] sm:$0xff]  ;;  %v650_v34 = vld [vmem:[%s1712_s10] sm:$0xff] }
  0xff   :  { %v318_v45 = vsel %vm298_vm4, %v316_v37, 0.0  ;;  %v1329_v31 = vpack.c.bf16 %v572_v27, %v571_v26  ;;  %v1333_v36 = vpack.c.bf16 %v651_v35, %v650_v34  ;;  %v653_v37 = vld [vmem:[%s1712_s10 + $0x18] sm:$0xff] }
 0x100   :  { %v319_v48 = vsel %vm299_vm5, %v317_v40, 0.0  ;;  %v326_v49 = vsel %vm298_vm4, %v324_v41, 0.0  ;;  %v327_v50 = vsel %vm299_vm5, %v325_v42, 0.0  ;;  %v328_v51 = vadd.f32 %v318_v45, %v292_v44 }
 0x101   :  { %v329_v52 = vadd.f32 %v319_v48, %v293_v43  ;;  %v333_v53 = vadd.f32 %v326_v49, %v294_v47  ;;  %v334_v54 = vadd.f32 %v327_v50, %v295_v46  ;;  %1334 = vmatprep.subr.bf16.mxu1 %v1333_v36 }
 0x102   :  { %330 = vst.msk [vmem:[#allocation2 + $0x2] sm:$0xff] %vm57_vm0, %v328_v51 }
 0x103   :  { %335 = vst.msk [vmem:[#allocation3 + $0x2] sm:$0xff] %vm57_vm0, %v333_v53  ;;  %v750_v53 = vld [vmem:[%s1713_s11 + $0x8] sm:$0xff] }
 0x104   :  { %336 = vst.msk [vmem:[#allocation3 + $0xa] sm:$0x3f] %vm331_vm6, %v334_v54  ;;  %332 = vst.msk [vmem:[#allocation2 + $0xa] sm:$0x3f] %vm331_vm6, %v329_v52  ;;  %v749_v52 = vld [vmem:[%s1713_s11] sm:$0xff] }
 0x105   :  { %v1341_v54 = vpack.c.bf16 %v750_v53, %v749_v52 }
 0x109   :  { %v342_v60 = vld [vmem:[#allocation2] sm:$0xff] }
 0x10a   :  { %v344_v62 = vld [vmem:[#allocation3] sm:$0xff]  ;;  %v360_v0 = vmul.f32 %v358_v57, %v342_v60  ;;  %v376_v1 = vmul.f32 %v366_v58, %v342_v60 }
 0x10b   :  { %v345_v63 = vld [vmem:[#allocation3 + $0x8] sm:$0xf]  ;;  %v368_v2 = vmul.f32 %v366_v58, %v344_v62  ;;  %v374_v4 = vmul.f32 %v358_v57, %v344_v62  ;;  %v343_v6 = vld [vmem:[#allocation2 + $0x8] sm:$0xf]  ;;  %v347_v20 = vld [vmem:[#allocation2 + $0xc] sm:$0xf] }
 0x10c   :  { %v369_v3 = vmul.f32 %v366_v58, %v345_v63  ;;  %v375_v5 = vmul.f32 %v358_v57, %v345_v63  ;;  %v361_v39 = vmul.f32 %v358_v57, %v343_v6  ;;  %v377_v7 = vmul.f32 %v366_v58, %v343_v6  ;;  %v348_v14 = vld [vmem:[#allocation3 + $0x4] sm:$0xff]  ;;  %v346_v15 = vld [vmem:[#allocation2 + $0x4] sm:$0xff]  ;;  %v349_v22 = vld [vmem:[#allocation3 + $0xc] sm:$0xf] }
 0x10d   :  { %v370_v8 = vsub.f32 %v360_v0, %v368_v2  ;;  %v378_v9 = vadd.f32 %v376_v1, %v374_v4  ;;  %v845_v58 = vld [vmem:[%s1714_s13] sm:$0xff]  ;;  %v847_v60 = vld [vmem:[%s1714_s13 + $0x10] sm:$0xff]  ;;  %v848_v62 = vld [vmem:[%s1714_s13 + $0x18] sm:$0xff] }
 0x10e   :  { %v371_v10 = vsub.f32 %v361_v39, %v369_v3  ;;  %v379_v12 = vadd.f32 %v377_v7, %v375_v5  ;;  %v1351_v61 = vpack.c.bf16 %v846_v59, %v845_v58  ;;  %v1355_v63 = vpack.c.bf16 %v848_v62, %v847_v60  ;;  %v841_v0 = vld [vmem:[%s1715_s12] sm:$0xff]  ;;  %v842_v1 = vld [vmem:[%s1715_s12 + $0x8] sm:$0xff] }
 0x10f   :  { %v372_v16 = vsel %vm352_vm7, %v370_v8, 0.0  ;;  %v380_v17 = vsel %vm352_vm7, %v378_v9, 0.0  ;;  %v1359_v2 = vpack.c.bf16 %v842_v1, %v841_v0 }
 0x110   :  { %v382_v18 = vadd.f32 %v372_v16, %v346_v15  ;;  %v387_v19 = vadd.f32 %v380_v17, %v348_v14  ;;  %v373_v21 = vsel %vm353_vm8, %v371_v10, 0.0  ;;  %v381_v23 = vsel %vm353_vm8, %v379_v12, 0.0  ;;  %v843_v17 = vld [vmem:[%s1715_s12 + $0x10] sm:$0xff] }
 0x111   :  { %v383_v24 = vadd.f32 %v373_v21, %v347_v20  ;;  %v388_v25 = vadd.f32 %v381_v23, %v349_v22  ;;  %v1008_v20 = vld [vmem:[%s1716_s14] sm:$0xff]  ;;  %v1009_v21 = vld [vmem:[%s1716_s14 + $0x8] sm:$0xff]  ;;  %v1010_v22 = vld [vmem:[%s1716_s14 + $0x10] sm:$0xff] }
 0x112   :  { %384 = vst.msk [vmem:[#allocation2 + $0x4] sm:$0xff] %vm57_vm0, %v382_v18  ;;  %389 = vst.msk [vmem:[#allocation3 + $0x4] sm:$0xff] %vm57_vm0, %v387_v19  ;;  %v844_v18 = vld [vmem:[%s1715_s12 + $0x18] sm:$0x3f]  ;;  %v1369_v23 = vpack.c.bf16 %v1009_v21, %v1008_v20 }
 0x113   :  { %386 = vst.msk [vmem:[#allocation2 + $0xc] sm:$0xf] %vm385_vm9, %v383_v24  ;;  %390 = vst.msk [vmem:[#allocation3 + $0xc] sm:$0xf] %vm385_vm9, %v388_v25  ;;  %v1363_v19 = vpack.c.bf16 %v844_v18, %v843_v17  ;;  %v1011_v24 = vld [vmem:[%s1716_s14 + $0x18] sm:$0xff] }
 0x114   :  { %v1373_v25 = vpack.c.bf16 %v1011_v24, %v1010_v22 }
 0x119   :  { %v391_v29 = vld [vmem:[#allocation2] sm:$0xff]  ;;  %v393_v30 = vld [vmem:[#allocation3] sm:$0xff] }
 0x11a   :  { %1213 = vmatprep.mubr.msk.f32.mxu0 %vm57_vm0, %v391_v29  ;;  %1224 = vmatprep.mubr.msk.f32.mxu1 %vm57_vm0, %v393_v30  ;;  %v392_v32 = vld [vmem:[#allocation2 + $0x8] sm:$0xff]  ;;  %v394_v33 = vld [vmem:[#allocation3 + $0x8] sm:$0xff] }
 0x11b   :  { %1214 = vmatmul.mubr.msk.f32.vlgmr.msra.gmra.mrb[2].mxu0 %vm57_vm0, %v392_v32  ;;  %1225 = vmatmul.mubr.msk.f32.vlgmr.msra.gmra.mrb[2].mxu1 %vm57_vm0, %v394_v33 }
 0x11c   :  { %1328 = vmatpush3.bf16.msra.mxu0 %v1541_v28  ;;  %1235 = vmatprep.mubr.msk.f32.mxu0 %vm57_vm0, %v1496_v11  ;;  %v652_v28 = vld [vmem:[%s1712_s10 + $0x10] sm:$0xff] }
 0x11d   :  { %1330 = vmatprep.subr.bf16.mxu0 %v1329_v31  ;;  %1336 = vmatpush3.bf16.msra.mxu1 %v1333_v36  ;;  %v1337_v38 = vpack.c.bf16 %v653_v37, %v652_v28 }
 0x11f   :  { %1338 = vmatprep.subr.bf16.mxu1 %v1337_v38 }
 0x120   :  { %1332 = vmatpush3.bf16.msra.mxu0 %v1329_v31 }
 0x121   :  { %1340 = vmatpush3.bf16.msra.mxu1 %v1337_v38  ;;  %1342 = vmatprep.subr.bf16.mxu0 %v1341_v54 }
 0x122   :  { %1352 = vmatprep.subr.bf16.mxu1 %v1351_v61 }
 0x123   :  { %1236 = vmatmul.mubr.msk.f32.vlgmr.msra.gmra.mrb[4].mxu0 %vm57_vm0, %v1505_v13 }
 0x124   :  { %1344 = vmatpush3.bf16.msra.mxu0 %v1341_v54 }
 0x1ee   :  { %v1215_v40 = vpop.f32.mrb[2].mxu0  ;;  %v1226_v41 = vpop.f32.mrb[2].mxu1 }
 0x1ef   :  { %v566_v42 = vsub.f32 %v1215_v40, %v1226_v41  ;;  %v471_v43 = vpop.f32.mrb[3].mxu0  ;;  %v556_v44 = vpop.f32.mrb[3].mxu1 }
 0x1f0   :  { %v565_v45 = vsub.f32 %v471_v43, %v556_v44 }
 0x1f1   :  { %v568_v46 = vmul.f32 2.0, %v566_v42 }
 0x1f2   :  { %v567_v47 = vmul.f32 2.0, %v565_v45 }
 0x1f6   :  { %v1237_v48 = vpop.f32.mrb[4].mxu0 }
 0x1f7   :  { %v649_v49 = vadd.f32 %v1237_v48, %v568_v46  ;;  %v639_v50 = vpop.f32.mrb[5].mxu0 }
 0x1f8   :  { %v648_v51 = vadd.f32 %v639_v50, %v567_v47 }
 0x1fa   :  { %1246 = vmatprep.mubr.msk.f32.mxu1 %vm57_vm0, %v648_v51 }
 0x1fb   :  { %1247 = vmatmul.mubr.msk.f32.vlgmr.msra.gmra.mrb[4].mxu1 %vm57_vm0, %v649_v49 }
 0x1fc   :  { %1268 = vmatprep.mubr.msk.f32.mxu1 %vm57_vm0, %v1496_v11  ;;  %v1345_v11 = vpack.c.bf16 %v752_v56, %v751_v55  ;;  %1354 = vmatpush3.bf16.msra.mxu1 %v1351_v61 }
 0x1fd   :  { %1356 = vmatprep.subr.bf16.mxu1 %v1355_v63 }
 0x1fe   :  { %1347 = vmatprep.subr.msk.bf16.mxu0 %vm1640_vm12, %v1345_v11 }
 0x1ff   :  { %1350 = vmatpush3.bf16.msk.msra.mxu0 %vm1640_vm12, %v1345_v11 }
 0x200   :  { %1358 = vmatpush3.bf16.msra.mxu1 %v1355_v63  ;;  %1370 = vmatprep.subr.bf16.mxu0 %v1369_v23 }
 0x201   :  { %1360 = vmatprep.subr.bf16.mxu1 %v1359_v2 }
 0x203   :  { %1269 = vmatmul.mubr.msk.f32.vlgmr.msra.gmra.mrb[6].mxu1 %vm57_vm0, %v1505_v13 }
 0x204   :  { %1362 = vmatpush3.bf16.msra.mxu1 %v1359_v2 }
 0x205   :  { %1365 = vmatprep.subr.msk.bf16.mxu1 %vm1640_vm12, %v1363_v19 }
 0x208   :  { %1368 = vmatpush3.bf16.msk.msra.mxu1 %vm1640_vm12, %v1363_v19 }
 0x2ce   :  { %v1248_v3 = vpop.f32.mrb[4].mxu1 }
 0x2cf   :  { %v736_v4 = vsub.f32 0.0, %v1248_v3  ;;  %v726_v5 = vpop.f32.mrb[5].mxu1 }
 0x2d0   :  { %v735_v6 = vsub.f32 0.0, %v726_v5 }
 0x2d1   :  { %v739_v39 = vmul.f32 1.442695, %v736_v4 }
 0x2d2   :  { %v737_v7 = vmul.f32 1.442695, %v735_v6 }
 0x2d3   :  { %1380 = vpow2.f32 %v739_v39 }
 0x2d4   :  { %1382 = vpow2.f32 %v737_v7 }
 0x2dd   :  { %v1381_v8 = vpop.eup %1380 }
 0x2de   :  { %v1383_v9 = vpop.eup %1382  ;;  %v742_v10 = vadd.f32 1.0, %v1381_v8 }
 0x2df   :  { %v741_v12 = vadd.f32 1.0, %v1383_v9 }
 0x2e0   :  { %1384 = vrcp.f32 %v742_v10 }
 0x2e1   :  { %1386 = vrcp.f32 %v741_v12 }
 0x2ea   :  { %v1385_v14 = vpop.eup %1384 }
 0x2eb   :  { %v1387_v15 = vpop.eup %1386  ;;  %v748_v13 = vmul.f32 %v1385_v14, %v1248_v3 }
 0x2ec   :  { %v747_v16 = vmul.f32 %v1387_v15, %v726_v5 }
 0x2ee   :  { %1257 = vmatprep.mubr.msk.f32.mxu0 %vm753_vm13, %v747_v16 }
 0x2ef   :  { %1258 = vmatmul.mubr.msk.f32.vlgmr.msra.gmra.mrb[6].mxu0 %vm753_vm13, %v748_v13 }
 0x2f0   :  { %1372 = vmatpush3.bf16.msra.mxu0 %v1369_v23 }
 0x2f1   :  { %1374 = vmatprep.subr.bf16.mxu0 %v1373_v25 }
 0x2f4   :  { %1376 = vmatpush3.bf16.msra.mxu0 %v1373_v25 }
 0x3c2   :  { %v1259_v26 = vpop.f32.mrb[6].mxu0 }
 0x3c3   :  { %v830_v27 = vpop.f32.mrb[7].mxu0  ;;  %v840_v30 = vmax.f32 %v1259_v26, 0.0 }
 0x3c4   :  { %v839_v29 = vmax.f32 %v830_v27, 0.0 }
 0x3c6   :  { %1279 = vmatprep.mubr.msk.f32.mxu1 %vm753_vm13, %v839_v29 }
 0x3c7   :  { %1280 = vmatmul.mubr.msk.f32.vlgmr.msra.gmra.mrb[6].mxu1 %vm753_vm13, %v840_v30 }
 0x49a   :  { %v1281_v31 = vpop.f32.mrb[6].mxu1 }
 0x49b   :  { %v999_v32 = vpop.f32.mrb[7].mxu1 }
 0x49c   :  { %1290 = vmatprep.mubr.msk.f32.mxu0 %vm57_vm0, %v999_v32 }
 0x49d   :  { %1291 = vmatmul.mubr.msk.f32.vlgmr.msra.gmra.mrb[8].mxu0 %vm57_vm0, %v1281_v31 }
 0x570   :  { %v1292_v33 = vpop.f32.mrb[8].mxu0 }
 0x571   :  { %1095 = vst.msk [vmem:[%s1717_s15 + $0x8] sm:$0xff] %vm1093_vm14, %v1292_v33  ;;  %v1084_v34 = vpop.f32.mrb[9].mxu0 }
 0x572   :  { %1094 = vst.msk [vmem:[%s1717_s15] sm:$0xff] %vm1093_vm14, %v1084_v34 }

// kernel: deep_lru_forward.2
= control target key start
LH: loop header
LB: loop body
LE: loop exit
PB: predicated region body
PF: predicated region fallthrough
CT: control target
= control target key end

     0   :  { %s2024_s0 = inlined_call_operand.vmem [shape: f32[16,4], index: 0, kind: input, shape index: {}]   ;;  %s2025_s1 = inlined_call_operand.vmem [shape: s32[16,32], index: 1, kind: input, shape index: {}]   ;;  %s2026_s2 = inlined_call_operand.hbm [shape: f32[4,32], index: 2, kind: input, shape index: {}]   ;;  %s2027_s3 = inlined_call_operand.vmem [shape: f32[32,32], index: 3, kind: input, shape index: {}]   ;;  %s2028_s4 = inlined_call_operand.hbm [shape: f32[32,32], index: 4, kind: input, shape index: {}]   ;;  %s2029_s5 = inlined_call_operand.vmem [shape: f32[1,32], index: 5, kind: input, shape index: {}]   ;;  %s2030_s6 = inlined_call_operand.vmem [shape: f32[1,32], index: 6, kind: input, shape index: {}]   ;;  %s2031_s7 = inlined_call_operand.vmem [shape: f32[1,32], index: 7, kind: input, shape index: {}]   ;;  %s2032_s8 = inlined_call_operand.vmem [shape: f32[32,32], index: 8, kind: input, shape index: {}]   ;;  %s2033_s9 = inlined_call_operand.hbm [shape: f32[32,32], index: 9, kind: input, shape index: {}]   ;;  %s2034_s10 = inlined_call_operand.hbm [shape: f32[32,32], index: 10, kind: input, shape index: {}]   ;;  %s2035_s11 = inlined_call_operand.hbm [shape: f32[32,30], index: 11, kind: input, shape index: {}]   ;;  %s2036_s12 = inlined_call_operand.hbm [shape: f32[30,30], index: 12, kind: input, shape index: {}]   ;;  %s2037_s13 = inlined_call_operand.hbm [shape: f32[30,32], index: 13, kind: input, shape index: {}]   ;;  %s2038_s14 = inlined_call_operand.hbm [shape: f32[32,32], index: 14, kind: input, shape index: {}]   ;;  %s2039_s15 = inlined_call_operand.vmem [shape: f32[16,32], index: 15, kind: output, shape index: {}]  }
   0x1   :  { %2041 = sst [smem:[#allocation22_spill]] %s2039_s15 }
   0x2   :  { %20 = vsyncpa [#allocation5], 0 }
   0x3   :  { %21 = vsyncpa [#allocation7], 0 }
   0x4   :  { %22 = vsyncpa [#allocation10], 0 }
   0x5   :  { %23 = vsyncpa [#allocation13], 0 }
   0x6   :  { %24 = vsyncpa [#allocation16], 0  ;;  %s1681_s18 = smov [#allocation6]   ;;  %s1495_s22 = scalar_lea.hbm %s2028_s4, 512 }
   0x7   :  { %s46_s19 = sshll.u32 %s1681_s18, 4  ;;  %p1496_p0 = scmp.ne.s32.totalorder %s2028_s4, %s1495_s22  ;;  %s47_s19 = int_to_ptr.vmem [resolvable:$true] %s46_s19 }
   0x8   :  { %p1499_p1 = scmp.lt.u32.totalorder %s1495_s22, %s2028_s4 }
   0xa   :  { %p1501_p2 = pnand %p1499_p1, %p1496_p0 }
   0xc   :  { %1504 = shalt.err (!%p1501_p2)
}
   0xd   :  { %s1505_s27 = scalar_lea.vmem %s47_s19, 512  ;;  %p1510_p4 = scmp.lt.s32.totalorder %s47_s19, %s47_s19 }
   0xe   :  { %p1506_p3 = scmp.ne.s32.totalorder %s47_s19, %s1505_s27  ;;  %p1511_p5 = scmp.lt.s32.totalorder %s1505_s27, %s1505_s27 }
  0x10   :  { %p1512_p6 = por %p1511_p5, %p1510_p4 }
  0x12   :  { %p1513_p7 = pnand %p1512_p6, %p1506_p3 }
  0x14   :  { %1516 = shalt.err (!%p1513_p7)
}
  0x15   :  { %s1682_s28 = smov 128   ;;  %s1683_s29 = smov 8  }
  0x16   :  { %52 = dma.hbm_to_vmem [thread:$0]  %s2028_s4, 512, %s47_s19, [#allocation7], %s1682_s28, %s1682_s28, %s1683_s29  }
  0x17   :  { %s1684_s17 = smov [#allocation9]   ;;  %s1685_s20 = smov [#allocation12]  }
  0x18   :  { %s78_s18 = sshll.u32 %s1684_s17, 4  ;;  %s102_s21 = sshll.u32 %s1685_s20, 4  ;;  %s79_s18 = int_to_ptr.vmem [resolvable:$true] %s78_s18  ;;  %s103_s21 = int_to_ptr.vmem [resolvable:$true] %s102_s21 }
  0x19   :  { %s1517_s24 = scalar_lea.hbm %s2034_s10, 512 }
  0x1a   :  { %p1518_p8 = scmp.ne.s32.totalorder %s2034_s10, %s1517_s24  ;;  %p1521_p9 = scmp.lt.u32.totalorder %s1517_s24, %s2034_s10 }
  0x1c   :  { %p1523_p10 = pnand %p1521_p9, %p1518_p8 }
  0x1e   :  { %1526 = shalt.err (!%p1523_p10)
}
  0x1f   :  { %s1527_s4 = scalar_lea.vmem %s79_s18, 512  ;;  %p1532_p12 = scmp.lt.s32.totalorder %s79_s18, %s79_s18 }
  0x20   :  { %p1528_p11 = scmp.ne.s32.totalorder %s79_s18, %s1527_s4  ;;  %p1533_p13 = scmp.lt.s32.totalorder %s1527_s4, %s1527_s4 }
  0x22   :  { %p1534_p0 = por %p1533_p13, %p1532_p12 }
  0x24   :  { %p1535_p1 = pnand %p1534_p0, %p1528_p11 }
  0x26   :  { %1538 = shalt.err (!%p1535_p1)
}
  0x27   :  { %84 = dma.hbm_to_vmem [thread:$0]  %s2034_s10, 512, %s79_s18, [#allocation10], %s1682_s28, %s1682_s28, %s1683_s29  }
  0x28   :  { %s1539_s17 = scalar_lea.hbm %s2036_s12, 512 }
  0x29   :  { %p1540_p2 = scmp.ne.s32.totalorder %s2036_s12, %s1539_s17  ;;  %p1543_p3 = scmp.lt.u32.totalorder %s1539_s17, %s2036_s12 }
  0x2b   :  { %p1545_p4 = pnand %p1543_p3, %p1540_p2 }
  0x2d   :  { %1548 = shalt.err (!%p1545_p4)
}
  0x2e   :  { %s1549_s25 = scalar_lea.vmem %s103_s21, 512  ;;  %p1554_p6 = scmp.lt.s32.totalorder %s103_s21, %s103_s21 }
  0x2f   :  { %p1550_p5 = scmp.ne.s32.totalorder %s103_s21, %s1549_s25  ;;  %p1555_p7 = scmp.lt.s32.totalorder %s1549_s25, %s1549_s25 }
  0x31   :  { %p1556_p8 = por %p1555_p7, %p1554_p6 }
  0x33   :  { %p1557_p9 = pnand %p1556_p8, %p1550_p5 }
  0x35   :  { %1560 = shalt.err (!%p1557_p9)
}
  0x36   :  { %108 = dma.hbm_to_vmem [thread:$0]  %s2036_s12, 512, %s103_s21, [#allocation13], %s1682_s28, %s1682_s28, %s1683_s29  }
  0x37   :  { %s1686_s26 = smov [#allocation4]   ;;  %s1687_s4 = smov [#allocation8]  }
  0x38   :  { %s35_s27 = sshll.u32 %s1686_s26, 4  ;;  %s66_s19 = sshll.u32 %s1687_s4, 4  ;;  %s36_s27 = int_to_ptr.vmem [resolvable:$true] %s35_s27  ;;  %s67_s19 = int_to_ptr.vmem [resolvable:$true] %s66_s19 }
  0x39   :  { %s1561_s15 = scalar_lea.hbm %s2026_s2, 64 }
  0x3a   :  { %p1562_p10 = scmp.ne.s32.totalorder %s2026_s2, %s1561_s15  ;;  %p1565_p11 = scmp.lt.u32.totalorder %s1561_s15, %s2026_s2 }
  0x3c   :  { %p1567_p12 = pnand %p1565_p11, %p1562_p10 }
  0x3e   :  { %1570 = shalt.err (!%p1567_p12)
}
  0x3f   :  { %s1571_s12 = scalar_lea.vmem %s36_s27, 64  ;;  %p1576_p0 = scmp.lt.s32.totalorder %s36_s27, %s36_s27 }
  0x40   :  { %p1572_p13 = scmp.ne.s32.totalorder %s36_s27, %s1571_s12  ;;  %p1577_p1 = scmp.lt.s32.totalorder %s1571_s12, %s1571_s12 }
  0x42   :  { %p1578_p2 = por %p1577_p1, %p1576_p0 }
  0x44   :  { %p1579_p3 = pnand %p1578_p2, %p1572_p13 }
  0x46   :  { %1582 = shalt.err (!%p1579_p3)
}
  0x47   :  { %38 = dma.hbm_to_vmem [thread:$0]  %s2026_s2, 64, %s36_s27, [#allocation5]  }
  0x48   :  { %s1583_s18 = scalar_lea.hbm %s2033_s9, 512 }
  0x49   :  { %p1584_p4 = scmp.ne.s32.totalorder %s2033_s9, %s1583_s18  ;;  %p1587_p5 = scmp.lt.u32.totalorder %s1583_s18, %s2033_s9 }
  0x4b   :  { %p1589_p6 = pnand %p1587_p5, %p1584_p4 }
  0x4d   :  { %1592 = shalt.err (!%p1589_p6)
}
  0x4e   :  { %s1593_s15 = scalar_lea.vmem %s67_s19, 512  ;;  %p1598_p8 = scmp.lt.s32.totalorder %s67_s19, %s67_s19 }
  0x4f   :  { %p1594_p7 = scmp.ne.s32.totalorder %s67_s19, %s1593_s15  ;;  %p1599_p9 = scmp.lt.s32.totalorder %s1593_s15, %s1593_s15 }
  0x51   :  { %p1600_p10 = por %p1599_p9, %p1598_p8 }
  0x53   :  { %p1601_p11 = pnand %p1600_p10, %p1594_p7 }
  0x55   :  { %1604 = shalt.err (!%p1601_p11)
}
  0x56   :  { %72 = dma.hbm_to_vmem [thread:$0]  %s2033_s9, 512, %s67_s19, [#allocation7], %s1682_s28, %s1682_s28, %s1683_s29  }
  0x57   :  { %s1688_s17 = smov [#allocation11]   ;;  %s1689_s22 = smov [#allocation14]  }
  0x58   :  { %s90_s20 = sshll.u32 %s1688_s17, 4  ;;  %s114_s23 = sshll.u32 %s1689_s22, 4  ;;  %s91_s20 = int_to_ptr.vmem [resolvable:$true] %s90_s20  ;;  %s115_s23 = int_to_ptr.vmem [resolvable:$true] %s114_s23 }
  0x59   :  { %s1605_s24 = scalar_lea.hbm %s2035_s11, 512 }
  0x5a   :  { %p1606_p12 = scmp.ne.s32.totalorder %s2035_s11, %s1605_s24  ;;  %p1609_p13 = scmp.lt.u32.totalorder %s1605_s24, %s2035_s11 }
  0x5c   :  { %p1611_p0 = pnand %p1609_p13, %p1606_p12 }
  0x5e   :  { %1614 = shalt.err (!%p1611_p0)
}
  0x5f   :  { %s1615_s9 = scalar_lea.vmem %s91_s20, 512  ;;  %p1620_p2 = scmp.lt.s32.totalorder %s91_s20, %s91_s20 }
  0x60   :  { %p1616_p1 = scmp.ne.s32.totalorder %s91_s20, %s1615_s9  ;;  %p1621_p3 = scmp.lt.s32.totalorder %s1615_s9, %s1615_s9 }
  0x62   :  { %p1622_p4 = por %p1621_p3, %p1620_p2 }
  0x64   :  { %p1623_p5 = pnand %p1622_p4, %p1616_p1 }
  0x66   :  { %1626 = shalt.err (!%p1623_p5)
}
  0x67   :  { %96 = dma.hbm_to_vmem [thread:$0]  %s2035_s11, 512, %s91_s20, [#allocation10], %s1682_s28, %s1682_s28, %s1683_s29  }
  0x68   :  { %s1627_s15 = scalar_lea.hbm %s2037_s13, 512 }
  0x69   :  { %p1628_p6 = scmp.ne.s32.totalorder %s2037_s13, %s1627_s15  ;;  %p1631_p7 = scmp.lt.u32.totalorder %s1627_s15, %s2037_s13 }
  0x6b   :  { %p1633_p8 = pnand %p1631_p7, %p1628_p6 }
  0x6d   :  { %1636 = shalt.err (!%p1633_p8)
}
  0x6e   :  { %s1637_s12 = scalar_lea.vmem %s115_s23, 512  ;;  %p1642_p10 = scmp.lt.s32.totalorder %s115_s23, %s115_s23 }
  0x6f   :  { %p1638_p9 = scmp.ne.s32.totalorder %s115_s23, %s1637_s12  ;;  %p1643_p11 = scmp.lt.s32.totalorder %s1637_s12, %s1637_s12 }
  0x71   :  { %p1644_p12 = por %p1643_p11, %p1642_p10 }
  0x73   :  { %p1645_p13 = pnand %p1644_p12, %p1638_p9 }
  0x75   :  { %1648 = shalt.err (!%p1645_p13)
}
  0x76   :  { %120 = dma.hbm_to_vmem [thread:$0]  %s2037_s13, 512, %s115_s23, [#allocation13], %s1682_s28, %s1682_s28, %s1683_s29  }
  0x77   :  { %s1690_s21 = smov [#allocation15]   ;;  %s1649_s18 = scalar_lea.hbm %s2038_s14, 512 }
  0x78   :  { %s126_s24 = sshll.u32 %s1690_s21, 4  ;;  %p1650_p0 = scmp.ne.s32.totalorder %s2038_s14, %s1649_s18  ;;  %s127_s24 = int_to_ptr.vmem [resolvable:$true] %s126_s24 }
  0x79   :  { %p1653_p1 = scmp.lt.u32.totalorder %s1649_s18, %s2038_s14 }
  0x7b   :  { %p1655_p2 = pnand %p1653_p1, %p1650_p0 }
  0x7d   :  { %1658 = shalt.err (!%p1655_p2)
}
  0x7e   :  { %s1659_s30 = scalar_lea.vmem %s127_s24, 512  ;;  %p1664_p4 = scmp.lt.s32.totalorder %s127_s24, %s127_s24 }
  0x7f   :  { %p1660_p3 = scmp.ne.s32.totalorder %s127_s24, %s1659_s30  ;;  %p1665_p5 = scmp.lt.s32.totalorder %s1659_s30, %s1659_s30 }
  0x81   :  { %p1666_p6 = por %p1665_p5, %p1664_p4 }
  0x83   :  { %p1667_p7 = pnand %p1666_p6, %p1660_p3 }
  0x85   :  { %1670 = shalt.err (!%p1667_p7)
}
  0x86   :  { %132 = dma.hbm_to_vmem [thread:$0]  %s2038_s14, 512, %s127_s24, [#allocation16], %s1682_s28, %s1682_s28, %s1683_s29  }
  0x87   :  { %1671 = dma.done.wait [#allocation5], 64  }
  0x88   :  { %1672 = vsyncadd [#allocation5], 4294967232 }
  0x89   :  { %1673 = dma.done.wait [#allocation7], 1024  }
  0x8a   :  { %1674 = vsyncadd [#allocation7], 4294966272 }
  0x8b   :  { %1675 = dma.done.wait [#allocation10], 1024  }
  0x8c   :  { %1676 = vsyncadd [#allocation10], 4294966272 }
  0x8d   :  { %1677 = dma.done.wait [#allocation13], 1024  }
  0x8e   :  { %1678 = vsyncadd [#allocation13], 4294966272 }
  0x8f   :  { %1679 = dma.done.wait [#allocation16], 512  }
  0x90   :  { %1680 = vsyncadd [#allocation16], 4294966784  ;;  %vm167_vm0 = vcmask 1043456   ;;  %vm160_vm1 = vcmask 31744   ;;  %v159_v0 = vld [vmem:[#allocation4] sm:$0xf]  ;;  %v441_v32 = vlaneseq }
  0x91   :  { %v157_v1 = vld [vmem:[%s2024_s0] sm:$0xff]  ;;  %v158_v2 = vld [vmem:[%s2024_s0 + $0x8] sm:$0xff]  ;;  %1294 = vmatprep.subr.msk.mxu1 %vm167_vm0, %v159_v0  ;;  %v249_v8 = vld [vmem:[%s2027_s3 + $0x10] sm:$0xff]  ;;  %vm251_vm2 = vcmask 261120   ;;  %vm471_vm4 = vcmask 260096   ;;  %vm525_vm8 = vcmask 259072  }
  0x92   :  { %1296 = vmatprep.mubr.msk.f32.mxu1 %vm160_vm1, %v157_v1  ;;  %v247_v3 = vld [vmem:[%s2027_s3] sm:$0xff]  ;;  %v248_v4 = vld [vmem:[%s2027_s3 + $0x8] sm:$0xff]  ;;  %1295 = vmatpush3.msk.msra.mxu1 %vm167_vm0, %v159_v0  ;;  %v250_v9 = vld [vmem:[%s2027_s3 + $0x18] sm:$0xff]  ;;  %v442_v34 = vshrl.u32 %v441_v32, 7  ;;  %vm579_vm11 = vcmask 257024   ;;  %vm954_vm12 = vcmask 1045504  }
  0x93   :  { %v343_v5 = vld [vmem:[#allocation6] sm:$0xff]  ;;  %v1398_v6 = vpack.c.bf16 %v248_v4, %v247_v3  ;;  %v344_v7 = vld [vmem:[#allocation6 + $0x8] sm:$0xff]  ;;  %1297 = vmatmul.mubr.msk.f32.vlgmr.msra.gmra.mrb[0].mxu1 %vm160_vm1, %v158_v2  ;;  %v1402_v11 = vpack.c.bf16 %v250_v9, %v249_v8  ;;  %v345_v12 = vld [vmem:[#allocation6 + $0x10] sm:$0xff]  ;;  %vm1691_vm13 = vmmov 1   ;;  %vm947_vm15 = vcmask 244736   ;;  %s2044_s12 = sld [smem:[#allocation22_spill]] }
  0x94   :  { %v1406_v10 = vpack.c.bf16 %v344_v7, %v343_v5  ;;  %v346_v13 = vld [vmem:[#allocation6 + $0x18] sm:$0xff]  ;;  %v590_v18 = vld [vmem:[%s2032_s8 + $0x8] sm:$0xff]  ;;  %v591_v22 = vld [vmem:[%s2032_s8 + $0x10] sm:$0xff]  ;;  %v1939_v43 = vsub.s32 0, %v442_v34 }
  0x95   :  { %1399 = vmatprep.subr.bf16.mxu1 %v1398_v6  ;;  %v1410_v14 = vpack.c.bf16 %v346_v13, %v345_v12  ;;  %v589_v17 = vld [vmem:[%s2032_s8] sm:$0xff]  ;;  %v675_v21 = vld [vmem:[#allocation8 + $0x8] sm:$0xff]  ;;  %v592_v23 = vld [vmem:[%s2032_s8 + $0x18] sm:$0xff] }
  0x96   :  { %1407 = vmatprep.subr.bf16.mxu0 %v1406_v10  ;;  %1401 = vmatpush3.bf16.msra.mxu1 %v1398_v6  ;;  %v674_v19 = vld [vmem:[#allocation8] sm:$0xff]  ;;  %v1414_v20 = vpack.c.bf16 %v590_v18, %v589_v17  ;;  %v1418_v25 = vpack.c.bf16 %v592_v23, %v591_v22  ;;  %v676_v26 = vld [vmem:[#allocation8 + $0x10] sm:$0xff]  ;;  %v677_v27 = vld [vmem:[#allocation8 + $0x18] sm:$0xff] }
  0x97   :  { %1409 = vmatpush3.bf16.msra.mxu0 %v1406_v10  ;;  %1403 = vmatprep.subr.bf16.mxu1 %v1402_v11  ;;  %v1422_v24 = vpack.c.bf16 %v675_v21, %v674_v19  ;;  %v1426_v28 = vpack.c.bf16 %v677_v27, %v676_v26  ;;  %v763_v29 = vld [vmem:[#allocation9] sm:$0xff]  ;;  %v764_v30 = vld [vmem:[#allocation9 + $0x8] sm:$0xff]  ;;  %v1218_v33 = vld [vmem:[%s2031_s7] ss:$0 sm:$0xff] }
  0x98   :  { %1411 = vmatprep.subr.bf16.mxu0 %v1410_v14  ;;  %v1931_v31 = vpack.c.bf16 %v764_v30, %v763_v29  ;;  %v426_v44 = vld [vmem:[%s2029_s5] sm:$0x1]  ;;  %v437_v48 = vld [vmem:[%s2025_s1 + $0x9] sm:$0x7f]  ;;  %v436_v56 = vld [vmem:[%s2025_s1 + $0x1] sm:$0xff] }
  0x99   :  { %v427_v45 = vld [vmem:[%s2030_s6] sm:$0x1]  ;;  %v444_v46 = vrot.slane %v426_v44, %v1939_v43  ;;  %vm439_vm3 = vcmp.ge.s32.totalorder %v437_v48, 1  ;;  %v477_v0 = vmul.f32 %v426_v44, %v426_v44  ;;  %vm438_vm5 = vcmp.ge.s32.totalorder %v436_v56, 1  ;;  %v490_v23 = vld [vmem:[%s2025_s1 + $0x2] sm:$0xff]  ;;  %vm2004_vm14 = vmpackc.low %vm954_vm12, %vm1691_vm13 }
  0x9a   :  { %1405 = vmatpush3.bf16.msra.mxu1 %v1402_v11  ;;  %v452_v47 = vrot.slane %v427_v45, %v1939_v43  ;;  %v478_v9 = vmul.f32 %v427_v45, %v427_v45  ;;  %v480_v10 = vmul.f32 2.0, %v426_v44  ;;  %v491_v26 = vld [vmem:[%s2025_s1 + $0xa] sm:$0x3f]  ;;  %vm492_vm6 = vcmp.ge.s32.totalorder %v490_v23, 2 }
  0x9b   :  { %1413 = vmatpush3.bf16.msra.mxu0 %v1410_v14  ;;  %1415 = vmatprep.subr.bf16.mxu1 %v1414_v20  ;;  %vm493_vm7 = vcmp.ge.s32.totalorder %v491_v26, 2 }
  0x9c   :  { %1423 = vmatprep.subr.bf16.mxu0 %v1422_v24  ;;  %v479_v19 = vsub.f32 %v477_v0, %v478_v9 }
  0x9e   :  { %v498_v21 = vrot.slane %v479_v19, %v1939_v43 }
 0x166   :  { %v1907_v15 = vpop.f32.mrb[0].mxu1 }
 0x167   :  { %v1909_v16 = vpop.f32.mrb[1].mxu1 }
 0x168   :  { %1307 = vmatprep.mubr.msk.f32.mxu1 %vm251_vm2, %v1909_v16  ;;  %1318 = vmatprep.mubr.msk.f32.mxu0 %vm251_vm2, %v1909_v16 }
 0x169   :  { %1308 = vmatmul.mubr.msk.f32.vlgmr.msra.gmra.mrb[2].mxu1 %vm251_vm2, %v1907_v15  ;;  %1319 = vmatmul.mubr.msk.f32.vlgmr.msra.gmra.mrb[0].mxu0 %vm251_vm2, %v1907_v15 }
 0x16a   :  { %1417 = vmatpush3.bf16.msra.mxu1 %v1414_v20  ;;  %1425 = vmatpush3.bf16.msra.mxu0 %v1422_v24  ;;  %v481_v20 = vmul.f32 %v480_v10, %v427_v45  ;;  %v531_v45 = vmul.f32 %v479_v19, %v479_v19 }
 0x16b   :  { %1419 = vmatprep.subr.bf16.mxu1 %v1418_v25  ;;  %1427 = vmatprep.subr.bf16.mxu0 %v1426_v28 }
 0x16c   :  { %v506_v22 = vrot.slane %v481_v20, %v1939_v43 }
 0x16e   :  { %1421 = vmatpush3.bf16.msra.mxu1 %v1418_v25  ;;  %1429 = vmatpush3.bf16.msra.mxu0 %v1426_v28 }
 0x16f   :  { %1431 = vmatprep.subr.bf16.mxu1 %v1931_v31 }
 0x23c   :  { %v1309_v35 = vpop.f32.mrb[2].mxu1  ;;  %v1320_v36 = vpop.f32.mrb[0].mxu0 }
 0x23d   :  { %v340_v37 = vmul.f32 %v1309_v35, %v1218_v33  ;;  %v423_v38 = vmul.f32 %v1320_v36, %v1218_v33  ;;  %v324_v39 = vpop.f32.mrb[3].mxu1  ;;  %v413_v40 = vpop.f32.mrb[1].mxu0 }
 0x23e   :  { %v339_v41 = vmul.f32 %v1218_v33, %v324_v39  ;;  %v422_v42 = vmul.f32 %v1218_v33, %v413_v40 }
 0x23f   :  { %342 = vst.msk [vmem:[#allocation2 + $0x8] sm:$0xff] %vm251_vm2, %v340_v37  ;;  %425 = vst.msk [vmem:[#allocation3 + $0x8] sm:$0xff] %vm251_vm2, %v423_v38 }
 0x240   :  { %341 = vst.msk [vmem:[#allocation2] sm:$0xff] %vm251_vm2, %v339_v41  ;;  %424 = vst.msk [vmem:[#allocation3] sm:$0xff] %vm251_vm2, %v422_v42 }
 0x246   :  { %v429_v49 = vld [vmem:[#allocation2 + $0x8] sm:$0x7f]  ;;  %v431_v50 = vld [vmem:[#allocation3 + $0x8] sm:$0x7f] }
 0x247   :  { %v447_v51 = vmul.f32 %v444_v46, %v429_v49  ;;  %v455_v52 = vmul.f32 %v452_v47, %v431_v50  ;;  %v461_v53 = vmul.f32 %v444_v46, %v431_v50  ;;  %v463_v54 = vmul.f32 %v452_v47, %v429_v49  ;;  %v428_v55 = vld [vmem:[#allocation2] sm:$0xff]  ;;  %v430_v58 = vld [vmem:[#allocation3] sm:$0xff]  ;;  %v433_v1 = vld [vmem:[#allocation2 + $0x9] sm:$0x7f] }
 0x248   :  { %v446_v57 = vmul.f32 %v444_v46, %v428_v55  ;;  %v462_v59 = vmul.f32 %v452_v47, %v428_v55  ;;  %v454_v62 = vmul.f32 %v452_v47, %v430_v58  ;;  %v460_v63 = vmul.f32 %v444_v46, %v430_v58  ;;  %v435_v2 = vld [vmem:[#allocation3 + $0x9] sm:$0x7f]  ;;  %v432_v11 = vld [vmem:[#allocation2 + $0x1] sm:$0xff]  ;;  %v434_v12 = vld [vmem:[#allocation3 + $0x1] sm:$0xff] }
 0x249   :  { %v457_v60 = vsub.f32 %v447_v51, %v455_v52  ;;  %v465_v61 = vadd.f32 %v463_v54, %v461_v53  ;;  %v532_v46 = vmul.f32 %v481_v20, %v481_v20  ;;  %v534_v47 = vmul.f32 2.0, %v479_v19 }
 0x24a   :  { %v456_v5 = vsub.f32 %v446_v57, %v454_v62  ;;  %v464_v6 = vadd.f32 %v462_v59, %v460_v63  ;;  %v544_v62 = vld [vmem:[%s2025_s1 + $0x4] sm:$0xff]  ;;  %v545_v63 = vld [vmem:[%s2025_s1 + $0xc] sm:$0xf] }
 0x24b   :  { %v459_v3 = vsel %vm439_vm3, %v457_v60, 0.0  ;;  %v467_v4 = vsel %vm439_vm3, %v465_v61, 0.0  ;;  %v533_v58 = vsub.f32 %v531_v45, %v532_v46  ;;  %v535_v59 = vmul.f32 %v534_v47, %v481_v20 }
 0x24c   :  { %v469_v7 = vadd.f32 %v459_v3, %v433_v1  ;;  %v474_v8 = vadd.f32 %v467_v4, %v435_v2  ;;  %v458_v13 = vsel %vm438_vm5, %v456_v5, 0.0  ;;  %v466_v14 = vsel %vm438_vm5, %v464_v6, 0.0 }
 0x24d   :  { %v468_v17 = vadd.f32 %v458_v13, %v432_v11  ;;  %v473_v18 = vadd.f32 %v466_v14, %v434_v12  ;;  %v552_v60 = vrot.slane %v533_v58, %v1939_v43  ;;  %v560_v61 = vrot.slane %v535_v59, %v1939_v43 }
 0x24e   :  { %472 = vst.msk [vmem:[#allocation2 + $0x9] sm:$0x7f] %vm471_vm4, %v469_v7  ;;  %476 = vst.msk [vmem:[#allocation3 + $0x9] sm:$0x7f] %vm471_vm4, %v474_v8  ;;  %vm546_vm9 = vcmp.ge.s32.totalorder %v544_v62, 4  ;;  %vm547_vm10 = vcmp.ge.s32.totalorder %v545_v63, 4 }
 0x24f   :  { %475 = vst.msk [vmem:[#allocation3 + $0x1] sm:$0xff] %vm251_vm2, %v473_v18  ;;  %470 = vst.msk [vmem:[#allocation2 + $0x1] sm:$0xff] %vm251_vm2, %v468_v17  ;;  %v944_v62 = vld [vmem:[#allocation12 + $0x8] sm:$0xff] }
 0x255   :  { %v487_v42 = vld [vmem:[#allocation2 + $0xa] sm:$0x3f]  ;;  %v489_v44 = vld [vmem:[#allocation3 + $0xa] sm:$0x3f] }
 0x256   :  { %v484_v24 = vld [vmem:[#allocation3] sm:$0xff]  ;;  %v485_v25 = vld [vmem:[#allocation3 + $0x8] sm:$0x3f]  ;;  %v482_v32 = vld [vmem:[#allocation2] sm:$0xff] }
 0x257   :  { %v508_v27 = vmul.f32 %v506_v22, %v484_v24  ;;  %v509_v28 = vmul.f32 %v506_v22, %v485_v25  ;;  %v514_v29 = vmul.f32 %v498_v21, %v484_v24  ;;  %v515_v30 = vmul.f32 %v498_v21, %v485_v25  ;;  %v483_v33 = vld [vmem:[#allocation2 + $0x8] sm:$0x3f]  ;;  %v488_v48 = vld [vmem:[#allocation3 + $0x2] sm:$0xff] }
 0x258   :  { %v500_v34 = vmul.f32 %v498_v21, %v482_v32  ;;  %v501_v35 = vmul.f32 %v498_v21, %v483_v33  ;;  %v516_v36 = vmul.f32 %v506_v22, %v482_v32  ;;  %v517_v37 = vmul.f32 %v506_v22, %v483_v33  ;;  %v486_v49 = vld [vmem:[#allocation2 + $0x2] sm:$0xff] }
 0x25a   :  { %v510_v38 = vsub.f32 %v500_v34, %v508_v27  ;;  %v511_v39 = vsub.f32 %v501_v35, %v509_v28  ;;  %v518_v40 = vadd.f32 %v516_v36, %v514_v29  ;;  %v519_v41 = vadd.f32 %v517_v37, %v515_v30  ;;  %v765_v29 = vld [vmem:[#allocation9 + $0x10] sm:$0xff]  ;;  %v766_v30 = vld [vmem:[#allocation9 + $0x18] sm:$0xff]  ;;  %v844_v37 = vld [vmem:[#allocation11] sm:$0xff] }
 0x25b   :  { %v1434_v34 = vpack.c.bf16 %v766_v30, %v765_v29 }
 0x25c   :  { %v512_v50 = vsel %vm492_vm6, %v510_v38, 0.0  ;;  %v513_v51 = vsel %vm493_vm7, %v511_v39, 0.0  ;;  %v520_v52 = vsel %vm492_vm6, %v518_v40, 0.0  ;;  %v521_v53 = vsel %vm493_vm7, %v519_v41, 0.0  ;;  %v845_v38 = vld [vmem:[#allocation11 + $0x8] sm:$0xff]  ;;  %v846_v40 = vld [vmem:[#allocation11 + $0x10] sm:$0xff] }
 0x25d   :  { %v522_v54 = vadd.f32 %v512_v50, %v486_v49  ;;  %v523_v55 = vadd.f32 %v513_v51, %v487_v42  ;;  %v527_v56 = vadd.f32 %v520_v52, %v488_v48  ;;  %v528_v57 = vadd.f32 %v521_v53, %v489_v44  ;;  %v847_v41 = vld [vmem:[#allocation11 + $0x18] sm:$0xff]  ;;  %v1039_v44 = vld [vmem:[#allocation15] sm:$0xff] }
 0x25e   :  { %v1438_v39 = vpack.c.bf16 %v845_v38, %v844_v37  ;;  %v1442_v42 = vpack.c.bf16 %v847_v41, %v846_v40 }
 0x25f   :  { %524 = vst.msk [vmem:[#allocation2 + $0x2] sm:$0xff] %vm251_vm2, %v522_v54  ;;  %529 = vst.msk [vmem:[#allocation3 + $0x2] sm:$0xff] %vm251_vm2, %v527_v56  ;;  %v1042_v56 = vld [vmem:[#allocation15 + $0x18] sm:$0xff] }
 0x260   :  { %526 = vst.msk [vmem:[#allocation2 + $0xa] sm:$0x3f] %vm525_vm8, %v523_v55  ;;  %530 = vst.msk [vmem:[#allocation3 + $0xa] sm:$0x3f] %vm525_vm8, %v528_v57  ;;  %1439 = vmatprep.subr.bf16.mxu0 %v1438_v39  ;;  %v1041_v55 = vld [vmem:[#allocation15 + $0x10] sm:$0xff] }
 0x266   :  { %v536_v0 = vld [vmem:[#allocation2] sm:$0xff]  ;;  %v538_v2 = vld [vmem:[#allocation3] sm:$0xff] }
 0x267   :  { %v537_v1 = vld [vmem:[#allocation2 + $0x8] sm:$0xf]  ;;  %v554_v3 = vmul.f32 %v552_v60, %v536_v0  ;;  %v562_v4 = vmul.f32 %v560_v61, %v538_v2  ;;  %v570_v5 = vmul.f32 %v560_v61, %v536_v0  ;;  %v539_v6 = vld [vmem:[#allocation3 + $0x8] sm:$0xf]  ;;  %v568_v7 = vmul.f32 %v552_v60, %v538_v2  ;;  %v541_v23 = vld [vmem:[#allocation2 + $0xc] sm:$0xf] }
 0x268   :  { %v555_v8 = vmul.f32 %v552_v60, %v537_v1  ;;  %v563_v9 = vmul.f32 %v560_v61, %v539_v6  ;;  %v569_v43 = vmul.f32 %v552_v60, %v539_v6  ;;  %v571_v10 = vmul.f32 %v560_v61, %v537_v1  ;;  %v540_v17 = vld [vmem:[#allocation2 + $0x4] sm:$0xff]  ;;  %v542_v19 = vld [vmem:[#allocation3 + $0x4] sm:$0xff]  ;;  %v543_v25 = vld [vmem:[#allocation3 + $0xc] sm:$0xf] }
 0x269   :  { %v564_v11 = vsub.f32 %v554_v3, %v562_v4  ;;  %v572_v12 = vadd.f32 %v570_v5, %v568_v7  ;;  %v1460_v60 = vpack.c.bf16 %v1042_v56, %v1041_v55  ;;  %v943_v61 = vld [vmem:[#allocation12] sm:$0xff]  ;;  %v945_v0 = vld [vmem:[#allocation12 + $0x10] sm:$0xff]  ;;  %v946_v1 = vld [vmem:[#allocation12 + $0x18] sm:$0x3f] }
 0x26a   :  { %v565_v13 = vsub.f32 %v555_v8, %v563_v9  ;;  %v573_v14 = vadd.f32 %v571_v10, %v569_v43  ;;  %v1446_v63 = vpack.c.bf16 %v944_v62, %v943_v61  ;;  %v1450_v2 = vpack.c.bf16 %v946_v1, %v945_v0 }
 0x26b   :  { %v566_v18 = vsel %vm546_vm9, %v564_v11, 0.0  ;;  %v574_v20 = vsel %vm546_vm9, %v572_v12, 0.0 }
 0x26c   :  { %v576_v21 = vadd.f32 %v566_v18, %v540_v17  ;;  %v581_v22 = vadd.f32 %v574_v20, %v542_v19  ;;  %v567_v24 = vsel %vm547_vm10, %v565_v13, 0.0  ;;  %v575_v26 = vsel %vm547_vm10, %v573_v14, 0.0  ;;  %v1037_v20 = vld [vmem:[#allocation14 + $0x10] sm:$0xff] }
 0x26d   :  { %v577_v27 = vadd.f32 %v567_v24, %v541_v23  ;;  %v582_v28 = vadd.f32 %v575_v26, %v543_v25 }
 0x26e   :  { %578 = vst.msk [vmem:[#allocation2 + $0x4] sm:$0xff] %vm251_vm2, %v576_v21  ;;  %583 = vst.msk [vmem:[#allocation3 + $0x4] sm:$0xff] %vm251_vm2, %v581_v22  ;;  %v1038_v21 = vld [vmem:[#allocation14 + $0x18] sm:$0x3f] }
 0x26f   :  { %580 = vst.msk [vmem:[#allocation2 + $0xc] sm:$0xf] %vm579_vm11, %v577_v27  ;;  %584 = vst.msk [vmem:[#allocation3 + $0xc] sm:$0xf] %vm579_vm11, %v582_v28  ;;  %v1468_v22 = vpack.c.bf16 %v1038_v21, %v1037_v20 }
 0x275   :  { %v585_v32 = vld [vmem:[#allocation2] sm:$0xff]  ;;  %v587_v33 = vld [vmem:[#allocation3] sm:$0xff] }
 0x276   :  { %1329 = vmatprep.mubr.msk.f32.mxu1 %vm251_vm2, %v585_v32  ;;  %1340 = vmatprep.mubr.msk.f32.mxu0 %vm251_vm2, %v587_v33  ;;  %v586_v35 = vld [vmem:[#allocation2 + $0x8] sm:$0xff]  ;;  %v588_v36 = vld [vmem:[#allocation3 + $0x8] sm:$0xff] }
 0x277   :  { %1330 = vmatmul.mubr.msk.f32.vlgmr.msra.gmra.mrb[4].mxu1 %vm251_vm2, %v586_v35  ;;  %1341 = vmatmul.mubr.msk.f32.vlgmr.msra.gmra.mrb[2].mxu0 %vm251_vm2, %v588_v36 }
 0x278   :  { %1433 = vmatpush3.bf16.msra.mxu1 %v1931_v31  ;;  %1351 = vmatprep.mubr.msk.f32.mxu1 %vm251_vm2, %v1909_v16  ;;  %v1040_v31 = vld [vmem:[#allocation15 + $0x8] sm:$0xff] }
 0x279   :  { %1435 = vmatprep.subr.bf16.mxu1 %v1434_v34  ;;  %1441 = vmatpush3.bf16.msra.mxu0 %v1438_v39  ;;  %v1456_v45 = vpack.c.bf16 %v1040_v31, %v1039_v44 }
 0x27a   :  { %1443 = vmatprep.subr.bf16.mxu0 %v1442_v42 }
 0x27c   :  { %1437 = vmatpush3.bf16.msra.mxu1 %v1434_v34 }
 0x27d   :  { %1445 = vmatpush3.bf16.msra.mxu0 %v1442_v42  ;;  %1447 = vmatprep.subr.bf16.mxu1 %v1446_v63 }
 0x27e   :  { %1457 = vmatprep.subr.bf16.mxu0 %v1456_v45 }
 0x27f   :  { %1352 = vmatmul.mubr.msk.f32.vlgmr.msra.gmra.mrb[6].mxu1 %vm251_vm2, %v1907_v15 }
 0x280   :  { %1449 = vmatpush3.bf16.msra.mxu1 %v1446_v63 }
 0x281   :  { %1452 = vmatprep.subr.msk.bf16.mxu1 %vm2004_vm14, %v1450_v2 }
 0x284   :  { %1455 = vmatpush3.bf16.msk.msra.mxu1 %vm2004_vm14, %v1450_v2 }
 0x34a   :  { %v1331_v46 = vpop.f32.mrb[4].mxu1  ;;  %v1342_v47 = vpop.f32.mrb[2].mxu0 }
 0x34b   :  { %v760_v48 = vsub.f32 %v1331_v46, %v1342_v47  ;;  %v665_v49 = vpop.f32.mrb[5].mxu1  ;;  %v750_v50 = vpop.f32.mrb[3].mxu0 }
 0x34c   :  { %v759_v51 = vsub.f32 %v665_v49, %v750_v50 }
 0x34d   :  { %v762_v52 = vmul.f32 2.0, %v760_v48 }
 0x34e   :  { %v761_v53 = vmul.f32 2.0, %v759_v51 }
 0x352   :  { %v1353_v54 = vpop.f32.mrb[6].mxu1 }
 0x353   :  { %v843_v57 = vadd.f32 %v1353_v54, %v762_v52  ;;  %v833_v58 = vpop.f32.mrb[7].mxu1 }
 0x354   :  { %v842_v59 = vadd.f32 %v833_v58, %v761_v53 }
 0x356   :  { %1362 = vmatprep.mubr.msk.f32.mxu0 %vm251_vm2, %v842_v59 }
 0x357   :  { %1363 = vmatmul.mubr.msk.f32.vlgmr.msra.gmra.mrb[4].mxu0 %vm251_vm2, %v843_v57 }
 0x358   :  { %1459 = vmatpush3.bf16.msra.mxu0 %v1456_v45  ;;  %1384 = vmatprep.mubr.msk.f32.mxu0 %vm251_vm2, %v1909_v16  ;;  %v1036_v16 = vld [vmem:[#allocation14 + $0x8] sm:$0xff] }
 0x359   :  { %1461 = vmatprep.subr.bf16.mxu0 %v1460_v60 }
 0x35c   :  { %1463 = vmatpush3.bf16.msra.mxu0 %v1460_v60 }
 0x35f   :  { %1385 = vmatmul.mubr.msk.f32.vlgmr.msra.gmra.mrb[6].mxu0 %vm251_vm2, %v1907_v15  ;;  %v1035_v15 = vld [vmem:[#allocation14] sm:$0xff] }
 0x360   :  { %v1464_v4 = vpack.c.bf16 %v1036_v16, %v1035_v15 }
 0x362   :  { %1465 = vmatprep.subr.bf16.mxu0 %v1464_v4 }
 0x363   :  { %1467 = vmatpush3.bf16.msra.mxu0 %v1464_v4 }
 0x364   :  { %1470 = vmatprep.subr.msk.bf16.mxu0 %vm2004_vm14, %v1468_v22 }
 0x367   :  { %1473 = vmatpush3.bf16.msk.msra.mxu0 %vm2004_vm14, %v1468_v22 }
 0x42a   :  { %v1364_v5 = vpop.f32.mrb[4].mxu0 }
 0x42b   :  { %v930_v6 = vsub.f32 0.0, %v1364_v5  ;;  %v920_v7 = vpop.f32.mrb[5].mxu0 }
 0x42c   :  { %v929_v8 = vsub.f32 0.0, %v920_v7 }
 0x42d   :  { %v933_v9 = vmul.f32 1.442695, %v930_v6 }
 0x42e   :  { %v931_v43 = vmul.f32 1.442695, %v929_v8 }
 0x42f   :  { %1487 = vpow2.f32 %v933_v9 }
 0x430   :  { %1489 = vpow2.f32 %v931_v43 }
 0x439   :  { %v1488_v10 = vpop.eup %1487 }
 0x43a   :  { %v1490_v11 = vpop.eup %1489  ;;  %v936_v12 = vadd.f32 1.0, %v1488_v10 }
 0x43b   :  { %v935_v13 = vadd.f32 1.0, %v1490_v11 }
 0x43c   :  { %1491 = vrcp.f32 %v936_v12 }
 0x43d   :  { %1493 = vrcp.f32 %v935_v13 }
 0x446   :  { %v1492_v14 = vpop.eup %1491 }
 0x447   :  { %v1494_v17 = vpop.eup %1493  ;;  %v942_v19 = vmul.f32 %v1492_v14, %v1364_v5 }
 0x448   :  { %v941_v18 = vmul.f32 %v1494_v17, %v920_v7 }
 0x44a   :  { %1373 = vmatprep.mubr.msk.f32.mxu1 %vm947_vm15, %v941_v18 }
 0x44b   :  { %1374 = vmatmul.mubr.msk.f32.vlgmr.msra.gmra.mrb[8].mxu1 %vm947_vm15, %v942_v19 }
 0x51e   :  { %v1375_v23 = vpop.f32.mrb[8].mxu1 }
 0x51f   :  { %v1024_v24 = vpop.f32.mrb[9].mxu1  ;;  %v1034_v26 = vmax.f32 %v1375_v23, 0.0 }
 0x520   :  { %v1033_v25 = vmax.f32 %v1024_v24, 0.0 }
 0x522   :  { %1395 = vmatprep.mubr.msk.f32.mxu0 %vm947_vm15, %v1033_v25 }
 0x523   :  { %1396 = vmatmul.mubr.msk.f32.vlgmr.msra.gmra.mrb[6].mxu0 %vm947_vm15, %v1034_v26 }
 0x5f6   :  { %v1397_v27 = vpop.f32.mrb[6].mxu0 }
 0x5f7   :  { %1203 = vst.msk [vmem:[%s2044_s12 + $0x8] sm:$0xff] %vm251_vm2, %v1397_v27  ;;  %v1193_v28 = vpop.f32.mrb[7].mxu0 }
 0x5f8   :  { %1202 = vst.msk [vmem:[%s2044_s12] sm:$0xff] %vm251_vm2, %v1193_v28 }
 0x5f9   :  { %1208 = vsyncpa [#allocation5], 1 }
 0x5fa   :  { %1209 = vsyncpa [#allocation7], 1 }
 0x5fb   :  { %1210 = vsyncpa [#allocation10], 1 }
 0x5fc   :  { %1211 = vsyncpa [#allocation13], 1 }
 0x5fd   :  { %1212 = vsyncpa [#allocation16], 1 }

</bundles_post_ra>
